<compile_context>
chip_gen: v7x
topology: tpu7x:2x2x1
jax: 0.10.0
libtpu: 0.0.40
codegen_flags: <defaults>
</compile_context>

<pallas_src>
import functools

import jax
import jax.numpy as jnp
from jax.experimental import pallas as pl
from jax.experimental.pallas import tpu as pltpu

EPS = 1e-5          # nn.LayerNorm default
NEG_INF = -1e30     # finite fill avoids exp(-inf - -inf) NaNs


def _layernorm(x, g, b):
    # x, g, b already float32
    mu = jnp.mean(x, axis=-1, keepdims=True)
    var = jnp.mean((x - mu) ** 2, axis=-1, keepdims=True)
    return (x - mu) * jax.lax.rsqrt(var + EPS) * g + b


def decoder_block_kernel(num_heads,
                         x_ref,
                         ln1_g, ln1_b, wq, bq, wk, bk, wv, bv,
                         wproj, bproj, ln2_g, ln2_b, w1c, b1c, w2c, b2,
                         out_ref,
                         k_hs, v_hs, q_hs, y_s, m_s, l_s, acc_s):
    qi = pl.program_id(1)
    H = num_heads
    TQ, C = x_ref.shape[1], x_ref.shape[2]
    D = C // H
    n_hc = w1c.shape[0]
    cdt = k_hs.dtype                     # MXU operand dtype (bf16 or f32)
    scale = 1.0 / (D ** 0.5)

    # ---- LN1 + Q/K/V projection for THIS row tile only ----------------------------
    x_t = x_ref[0].astype(jnp.float32)                          # (TQ, C) f32
    h1 = _layernorm(x_t, ln1_g[...], ln1_b[...]).astype(cdt)

    q = jnp.dot(h1, wq[...], preferred_element_type=jnp.float32) + bq[...]
    q = q * scale                                               # fold 1/sqrt(D): O(TQ*C)
    k_t = jnp.dot(h1, wk[...], preferred_element_type=jnp.float32) + bk[...]
    v_t = jnp.dot(h1, wv[...], preferred_element_type=jnp.float32) + bv[...]

    # Stage head-major.  K/V land in this tile's persistent slot (qi); earlier slots
    # already hold this batch row's earlier tiles (qi axis runs sequentially).
    # TODO(synk): replace the per-head half-lane stores with one lane-dense
    #             einshape('q(hd)->hqd') store once grouping-reshape support is confirmed.
    for h in range(H):
        q_hs[h] = q[:, h * D:(h + 1) * D].astype(cdt)
        k_hs[qi, h] = k_t[:, h * D:(h + 1) * D].astype(cdt)
        v_hs[qi, h] = v_t[:, h * D:(h + 1) * D].astype(cdt)

    # ---- causally-blocked attention with online softmax (KV block == TQ rows) -----
    qh = q_hs[...]                                              # (H, TQ, D)
    m_s[...] = jnp.full(m_s.shape, NEG_INF, jnp.float32)
    l_s[...] = jnp.zeros(l_s.shape, jnp.float32)
    acc_s[...] = jnp.zeros(acc_s.shape, jnp.float32)

    def attend(k_blk, v_blk, mask):
        s = jnp.einsum('hqd,hkd->hqk', qh, k_blk,
                       preferred_element_type=jnp.float32)      # (H, TQ, TQ) f32
        if mask is not None:
            s = jnp.where(mask, s, NEG_INF)
        m_prev = m_s[...]
        m_new = jnp.maximum(m_prev, jnp.max(s, axis=-1, keepdims=True))
        alpha = jnp.exp(m_prev - m_new)
        p = jnp.exp(s - m_new)                                  # unnormalized (deferred)
        l_s[...] = alpha * l_s[...] + jnp.sum(p, axis=-1, keepdims=True)
        acc_s[...] = alpha * acc_s[...] + jnp.einsum(
            'hqk,hkd->hqd', p.astype(cdt), v_blk, preferred_element_type=jnp.float32)
        m_s[...] = m_new

    @pl.loop(0, qi)                       # fully-visible KV blocks: no mask; blocks
    def _(kvi):                           # above the causal diagonal are skipped.
        attend(k_hs[kvi], v_hs[kvi], None)

    row = jax.lax.broadcasted_iota(jnp.int32, (TQ, TQ), 0)
    col = jax.lax.broadcasted_iota(jnp.int32, (TQ, TQ), 1)
    attend(k_hs[qi], v_hs[qi], (row >= col)[None, :, :])        # mask only on diagonal blk

    inv = pl.reciprocal(l_s[...], approx=True)                  # (H, TQ, 1), EUP slot
    y = acc_s[...] * inv                                        # deferred normalization
    for h in range(H):                                          # concat heads via scratch
        y_s[:, h * D:(h + 1) * D] = y[h]

    attn = jnp.dot(y_s[...].astype(cdt), wproj[...],
                   preferred_element_type=jnp.float32) + bproj[...]
    x1 = x_t + attn                                             # first residual (f32)

    # ---- LN2 + MLP (Linear -> GELU(tanh) -> Linear -> Dropout[eval]) --------------
    h2 = _layernorm(x1, ln2_g[...], ln2_b[...]).astype(cdt)

    def mlp_chunk(j, acc):
        z = jnp.dot(h2, w1c[j], preferred_element_type=jnp.float32) + b1c[j]
        z = jax.nn.gelu(z, approximate=True).astype(cdt)        # GELU(approximate='tanh')
        return acc + jnp.dot(z, w2c[j], preferred_element_type=jnp.float32)

    ff = jax.lax.fori_loop(0, n_hc, mlp_chunk,
                           jnp.zeros((TQ, C), jnp.float32), unroll=(n_hc <= 4))
    ff = ff + b2[...]
    # nn.Dropout(p=0.5) is identity in eval mode.
    # TODO(synk): training-mode dropout not implemented in the kernel.

    out_ref[0] = (x1 + ff).astype(out_ref.dtype)                # one lane-dense store/tile


# ------------------------------ wrapper / tiling ------------------------------------
def _vmem_capacity_bytes():
    try:
        info = pltpu.get_tpu_info()
        cap = getattr(info, "vmem_capacity_bytes", None)
        if cap:
            return int(cap)
    except Exception:
        pass
    return 128 * 1024 * 1024


def _pick_hidden_chunk(hidden):
    for cand in (512, 256, 128):
        if hidden % cand == 0:
            return cand
    return hidden


def _estimate_vmem_bytes(T, C, H, TQ, csize, hc):
    f32 = 4
    kv_scratch = 2 * T * C * csize                    # persistent K/V blocks
    head_scratch = TQ * C * csize + TQ * C * f32      # q_hs + y_s
    stat_scratch = 2 * H * TQ * 128 * f32             # m/l: lane dim pads to 128
    acc_scratch = TQ * C * f32
    weights = 2 * (12 * C * C * csize + 16 * C * f32)  # double-buffered weights/biases
    io = 2 * 2 * TQ * C * f32                          # x tile + out tile, double-buffered
    live = H * TQ * TQ * f32 + 4 * TQ * C * f32 + TQ * hc * f32
    return kv_scratch + head_scratch + stat_scratch + acc_scratch + weights + io + live


def _pick_row_tile(T, C, H, csize, hc, budget):
    divisors = [c for c in (512, 256, 128, 64, 32, 16, 8) if c <= T and T % c == 0]
    for cand in divisors:                              # largest tile that fits the budget
        if _estimate_vmem_bytes(T, C, H, cand, csize, hc) <= budget:
            return cand
    return divisors[-1] if divisors else T


def decoder_block(x, params, num_heads, *, compute_dtype=jnp.bfloat16):
    B, T, C = x.shape
    assert C % num_heads == 0
    D = C // num_heads
    cdt = jnp.dtype(compute_dtype)
    f32 = jnp.float32
    csize = cdt.itemsize

    hidden = 4 * C
    hc = _pick_hidden_chunk(hidden)
    n_hc = hidden // hc

    cap = _vmem_capacity_bytes()                       # 64 MiB on v7x, 128 MiB on v5e/v6e
    vmem_limit = max(32 * 1024 * 1024, min(int(cap * 5 // 8), 100 * 1024 * 1024))
    tq = _pick_row_tile(T, C, num_heads, csize, hc, int(vmem_limit * 0.85))
    nq = T // tq

    # Weights (MXU operands) in the compute dtype; LayerNorm params / biases stay f32.
    # astype is a no-op if the caller already stores params in the right dtype.
    wqkv = params["wqkv"]
    bqkv = params["bqkv"].astype(f32)
    wq = wqkv[:, :C].astype(cdt)
    wk = wqkv[:, C:2 * C].astype(cdt)
    wv = wqkv[:, 2 * C:].astype(cdt)
    bq, bk, bv = bqkv[:, :C], bqkv[:, C:2 * C], bqkv[:, 2 * C:]
    wproj = params["wproj"].astype(cdt)
    bproj = params["bproj"].astype(f32)
    ln1_g = params["ln1_g"].astype(f32)
    ln1_b = params["ln1_b"].astype(f32)
    ln2_g = params["ln2_g"].astype(f32)
    ln2_b = params["ln2_b"].astype(f32)
    # MLP weights pre-chunked along the hidden dim (one-time XLA reshape, outside kernel).
    w1c = params["w1"].reshape(C, n_hc, hc).transpose(1, 0, 2).astype(cdt)   # (n_hc, C, hc)
    b1c = params["b1"].reshape(n_hc, hc)[:, None, :].astype(f32)             # (n_hc, 1, hc)
    w2c = params["w2"].reshape(n_hc, hc, C).astype(cdt)                      # (n_hc, hc, C)
    b2 = params["b2"].astype(f32)

    param_list = [ln1_g, ln1_b, wq, bq, wk, bk, wv, bv, wproj, bproj,
                  ln2_g, ln2_b, w1c, b1c, w2c, b2]

    def _const_index_map(ndim):
        return lambda b, qi: (0,) * ndim

    x_spec = pl.BlockSpec((1, tq, C), lambda b, qi: (b, qi, 0))
    # Constant index_map -> weights are not re-fetched between grid steps.
    # TODO(synk): mark these pipeline_mode=pl.Buffered(1) (single-buffered) once
    #             buffer_count==1 support is confirmed, halving their VMEM footprint.
    param_specs = [pl.BlockSpec(w.shape, _const_index_map(w.ndim)) for w in param_list]

    flops = int(2 * B * T * 12 * C * C + 2 * B * T * T * C)       # proj/MLP + causal attn
    transcendentals = int(B * (num_heads * T * T // 2 + T * 4 * C))
    bytes_accessed = int(2 * x.size * x.dtype.itemsize
                         + sum(int(w.size) * w.dtype.itemsize for w in param_list))

    return pl.pallas_call(
        functools.partial(decoder_block_kernel, num_heads),
        out_shape=jax.ShapeDtypeStruct((B, T, C), x.dtype),
        grid_spec=pltpu.PrefetchScalarGridSpec(
            num_scalar_prefetch=0,
            grid=(B, nq),                          # b parallel, q-row tiles sequential
            in_specs=[x_spec] + param_specs,
            out_specs=x_spec,
            scratch_shapes=[
                pltpu.VMEM((nq, num_heads, tq, D), cdt),   # K blocks (persist across qi)
                pltpu.VMEM((nq, num_heads, tq, D), cdt),   # V blocks
                pltpu.VMEM((num_heads, tq, D), cdt),       # Q tile, head-major
                pltpu.VMEM((tq, C), f32),                  # attention output (head concat)
                pltpu.VMEM((num_heads, tq, 1), f32),       # online-softmax running max
                pltpu.VMEM((num_heads, tq, 1), f32),       # online-softmax running denom
                pltpu.VMEM((num_heads, tq, D), f32),       # online-softmax accumulator
            ]),
        compiler_params=pltpu.CompilerParams(
            dimension_semantics=("parallel", "arbitrary"),
            vmem_limit_bytes=vmem_limit),
        cost_estimate=pl.CostEstimate(flops=flops,
                                      transcendentals=transcendentals,
                                      bytes_accessed=bytes_accessed),
    )(x, *param_list)


# ---------------- pure-JAX reference (for correctness check) ----------------
def decoder_block_ref(x, p, num_heads):
    B, T, C = x.shape
    D = C // num_heads

    def ln(z, g, b):
        mu = jnp.mean(z, -1, keepdims=True)
        var = jnp.mean((z - mu) ** 2, -1, keepdims=True)
        return (z - mu) / jnp.sqrt(var + EPS) * g + b

    h = ln(x, p["ln1_g"][0], p["ln1_b"][0])
    qkv = h @ p["wqkv"] + p["bqkv"][0]
    q, k, v = jnp.split(qkv, 3, axis=-1)
    q = q.reshape(B, T, num_heads, D).transpose(0, 2, 1, 3)
    k = k.reshape(B, T, num_heads, D).transpose(0, 2, 1, 3)
    v = v.reshape(B, T, num_heads, D).transpose(0, 2, 1, 3)
    s = jnp.einsum("bhqd,bhkd->bhqk", q, k) / jnp.sqrt(D)
    mask = jnp.tril(jnp.ones((T, T), bool))
    s = jnp.where(mask, s, -jnp.inf)
    a = jax.nn.softmax(s, axis=-1)
    y = jnp.einsum("bhqk,bhkd->bhqd", a, v).transpose(0, 2, 1, 3).reshape(B, T, C)
    x1 = x + (y @ p["wproj"] + p["bproj"][0])
    h2 = ln(x1, p["ln2_g"][0], p["ln2_b"][0])
    ff = jax.nn.gelu(h2 @ p["w1"] + p["b1"][0], approximate=True)
    ff = ff @ p["w2"] + p["b2"][0]
    return x1 + ff


if __name__ == "__main__":
    B, T, C, H = 2, 8, 32, 4
    key = jax.random.PRNGKey(0)
    ks = jax.random.split(key, 10)

    params = {
        "ln1_g": jnp.ones((1, C), jnp.float32),
        "ln1_b": jnp.zeros((1, C), jnp.float32),
        "wqkv": 0.05 * jax.random.normal(ks[0], (C, 3 * C), jnp.float32),
        "bqkv": 0.05 * jax.random.normal(ks[1], (1, 3 * C), jnp.float32),
        "wproj": 0.05 * jax.random.normal(ks[2], (C, C), jnp.float32),
        "bproj": 0.05 * jax.random.normal(ks[3], (1, C), jnp.float32),
        "ln2_g": jnp.ones((1, C), jnp.float32),
        "ln2_b": jnp.zeros((1, C), jnp.float32),
        "w1": 0.05 * jax.random.normal(ks[4], (C, 4 * C), jnp.float32),
        "b1": 0.05 * jax.random.normal(ks[5], (1, 4 * C), jnp.float32),
        "w2": 0.05 * jax.random.normal(ks[6], (4 * C, C), jnp.float32),
        "b2": 0.05 * jax.random.normal(ks[7], (1, C), jnp.float32),
    }

    x = jax.random.normal(ks[8], (B, T, C), jnp.float32)

    ref = decoder_block_ref(x, params, H)

    # f32 compute path: tight-ish check (approx reciprocal is ~1e-3 rel at worst).
    out_f32 = jax.block_until_ready(decoder_block(x, params, H, compute_dtype=jnp.float32))
    assert out_f32.shape == (B, T, C)
    assert jnp.allclose(out_f32, ref, atol=1e-2, rtol=1e-2), (
        f"f32 max diff {jnp.max(jnp.abs(out_f32 - ref))}")

    # bf16 compute path (default): matmuls at MXU-native precision, f32 everything else.
    out_bf16 = jax.block_until_ready(decoder_block(x, params, H))
    assert out_bf16.shape == (B, T, C)
    assert jnp.allclose(out_bf16, ref, atol=5e-2, rtol=5e-2), (
        f"bf16 max diff {jnp.max(jnp.abs(out_bf16 - ref))}")

    print("KERNEL_OK")
</pallas_src>

<mosaic_0001>
module attributes {stable_mosaic.version = 11 : i64} {
  func.func @decoder_block_kernel(%arg0: i32, %arg1: i32, %arg2: memref<1x8x32xf32, #tpu.memory_space<vmem>>, %arg3: memref<1x32xf32, #tpu.memory_space<vmem>>, %arg4: memref<1x32xf32, #tpu.memory_space<vmem>>, %arg5: memref<32x32xf32, #tpu.memory_space<vmem>>, %arg6: memref<1x32xf32, #tpu.memory_space<vmem>>, %arg7: memref<32x32xf32, #tpu.memory_space<vmem>>, %arg8: memref<1x32xf32, #tpu.memory_space<vmem>>, %arg9: memref<32x32xf32, #tpu.memory_space<vmem>>, %arg10: memref<1x32xf32, #tpu.memory_space<vmem>>, %arg11: memref<32x32xf32, #tpu.memory_space<vmem>>, %arg12: memref<1x32xf32, #tpu.memory_space<vmem>>, %arg13: memref<1x32xf32, #tpu.memory_space<vmem>>, %arg14: memref<1x32xf32, #tpu.memory_space<vmem>>, %arg15: memref<1x32x128xf32, #tpu.memory_space<vmem>>, %arg16: memref<1x1x128xf32, #tpu.memory_space<vmem>>, %arg17: memref<1x128x32xf32, #tpu.memory_space<vmem>>, %arg18: memref<1x32xf32, #tpu.memory_space<vmem>>, %arg19: memref<1x8x32xf32, #tpu.memory_space<vmem>>, %arg20: memref<1x4x8x8xf32, #tpu.memory_space<vmem>>, %arg21: memref<1x4x8x8xf32, #tpu.memory_space<vmem>>, %arg22: memref<4x8x8xf32, #tpu.memory_space<vmem>>, %arg23: memref<8x32xf32, #tpu.memory_space<vmem>>, %arg24: memref<4x8x1xf32, #tpu.memory_space<vmem>>, %arg25: memref<4x8x1xf32, #tpu.memory_space<vmem>>, %arg26: memref<4x8x8xf32, #tpu.memory_space<vmem>>) attributes {dimension_semantics = [#tpu.dimension_semantics<parallel>, #tpu.dimension_semantics<arbitrary>], iteration_bounds = array<i64: 2, 1>, scalar_prefetch = 0 : i64, scratch_operands = 7 : i64, tpu.core_type = #tpu.core_type<tc>, window_params = [{transform_indices = @transform_0, window_bounds = array<i64: 1, 8, 32>}, {pipeline_mode = #tpu.pipeline_mode<synchronous>, transform_indices = @transform_1, window_bounds = array<i64: 1, 32>}, {pipeline_mode = #tpu.pipeline_mode<synchronous>, transform_indices = @transform_2, window_bounds = array<i64: 1, 32>}, {pipeline_mode = #tpu.pipeline_mode<synchronous>, transform_indices = @transform_3, window_bounds = array<i64: 32, 32>}, {pipeline_mode = #tpu.pipeline_mode<synchronous>, transform_indices = @transform_4, window_bounds = array<i64: 1, 32>}, {pipeline_mode = #tpu.pipeline_mode<synchronous>, transform_indices = @transform_5, window_bounds = array<i64: 32, 32>}, {pipeline_mode = #tpu.pipeline_mode<synchronous>, transform_indices = @transform_6, window_bounds = array<i64: 1, 32>}, {pipeline_mode = #tpu.pipeline_mode<synchronous>, transform_indices = @transform_7, window_bounds = array<i64: 32, 32>}, {pipeline_mode = #tpu.pipeline_mode<synchronous>, transform_indices = @transform_8, window_bounds = array<i64: 1, 32>}, {pipeline_mode = #tpu.pipeline_mode<synchronous>, transform_indices = @transform_9, window_bounds = array<i64: 32, 32>}, {pipeline_mode = #tpu.pipeline_mode<synchronous>, transform_indices = @transform_10, window_bounds = array<i64: 1, 32>}, {pipeline_mode = #tpu.pipeline_mode<synchronous>, transform_indices = @transform_11, window_bounds = array<i64: 1, 32>}, {pipeline_mode = #tpu.pipeline_mode<synchronous>, transform_indices = @transform_12, window_bounds = array<i64: 1, 32>}, {pipeline_mode = #tpu.pipeline_mode<synchronous>, transform_indices = @transform_13, window_bounds = array<i64: 1, 32, 128>}, {pipeline_mode = #tpu.pipeline_mode<synchronous>, transform_indices = @transform_14, window_bounds = array<i64: 1, 1, 128>}, {pipeline_mode = #tpu.pipeline_mode<synchronous>, transform_indices = @transform_15, window_bounds = array<i64: 1, 128, 32>}, {pipeline_mode = #tpu.pipeline_mode<synchronous>, transform_indices = @transform_16, window_bounds = array<i64: 1, 32>}, {transform_indices = @transform_17, window_bounds = array<i64: 1, 8, 32>}]} {
    %c0 = arith.constant 0 : index
    %c0_0 = arith.constant 0 : index
    %c0_1 = arith.constant 0 : index
    %0 = vector.load %arg2[%c0, %c0_0, %c0_1] : memref<1x8x32xf32, #tpu.memory_space<vmem>>, vector<1x8x32xf32>
    %1 = vector.shape_cast %0 : vector<1x8x32xf32> to vector<8x32xf32>
    %c0_2 = arith.constant 0 : index
    %c0_3 = arith.constant 0 : index
    %2 = vector.load %arg3[%c0_2, %c0_3] : memref<1x32xf32, #tpu.memory_space<vmem>>, vector<1x32xf32>
    %c0_4 = arith.constant 0 : index
    %c0_5 = arith.constant 0 : index
    %3 = vector.load %arg4[%c0_4, %c0_5] : memref<1x32xf32, #tpu.memory_space<vmem>>, vector<1x32xf32>
    %cst = arith.constant dense<0.000000e+00> : vector<8xf32>
    %4 = vector.multi_reduction <add>, %1, %cst [1] : vector<8x32xf32> to vector<8xf32>
    %5 = vector.shape_cast %4 : vector<8xf32> to vector<8x1xf32>
    %cst_6 = arith.constant 3.200000e+01 : f32
    %6 = vector.broadcast %cst_6 : f32 to vector<8x1xf32>
    %7 = arith.divf %5, %6 : vector<8x1xf32>
    %8 = vector.broadcast %7 : vector<8x1xf32> to vector<8x32xf32>
    %9 = arith.subf %1, %8 : vector<8x32xf32>
    %10 = arith.mulf %9, %9 : vector<8x32xf32>
    %cst_7 = arith.constant dense<0.000000e+00> : vector<8xf32>
    %11 = vector.multi_reduction <add>, %10, %cst_7 [1] : vector<8x32xf32> to vector<8xf32>
    %12 = vector.shape_cast %11 : vector<8xf32> to vector<8x1xf32>
    %cst_8 = arith.constant 3.200000e+01 : f32
    %13 = vector.broadcast %cst_8 : f32 to vector<8x1xf32>
    %14 = arith.divf %12, %13 : vector<8x1xf32>
    %15 = vector.broadcast %7 : vector<8x1xf32> to vector<8x32xf32>
    %16 = arith.subf %1, %15 : vector<8x32xf32>
    %cst_9 = arith.constant 9.99999974E-6 : f32
    %17 = vector.broadcast %cst_9 : f32 to vector<8x1xf32>
    %18 = arith.addf %14, %17 : vector<8x1xf32>
    %19 = math.rsqrt %18 : vector<8x1xf32>
    %20 = vector.broadcast %19 : vector<8x1xf32> to vector<8x32xf32>
    %21 = arith.mulf %16, %20 : vector<8x32xf32>
    %22 = vector.broadcast %2 : vector<1x32xf32> to vector<8x32xf32>
    %23 = arith.mulf %21, %22 : vector<8x32xf32>
    %24 = vector.broadcast %3 : vector<1x32xf32> to vector<8x32xf32>
    %25 = arith.addf %23, %24 : vector<8x32xf32>
    %c0_10 = arith.constant 0 : index
    %c0_11 = arith.constant 0 : index
    %26 = vector.load %arg5[%c0_10, %c0_11] : memref<32x32xf32, #tpu.memory_space<vmem>>, vector<32x32xf32>
    %cst_12 = arith.constant dense<0.000000e+00> : vector<8x32xf32>
    %27 = tpu.matmul %25, %26, %cst_12 {dimension_numbers = #tpu.dot_dimension_numbers<[1], [0], [0], [1], [0, 0, 1, 1], [], []>} : vector<8x32xf32>, vector<32x32xf32>, vector<8x32xf32> -> vector<8x32xf32>
    %c0_13 = arith.constant 0 : index
    %c0_14 = arith.constant 0 : index
    %28 = vector.load %arg6[%c0_13, %c0_14] : memref<1x32xf32, #tpu.memory_space<vmem>>, vector<1x32xf32>
    %29 = vector.broadcast %28 : vector<1x32xf32> to vector<8x32xf32>
    %30 = arith.addf %27, %29 : vector<8x32xf32>
    %cst_15 = arith.constant 0.353553385 : f32
    %31 = vector.broadcast %cst_15 : f32 to vector<8x32xf32>
    %32 = arith.mulf %30, %31 : vector<8x32xf32>
    %c0_16 = arith.constant 0 : index
    %c0_17 = arith.constant 0 : index
    %33 = vector.load %arg7[%c0_16, %c0_17] : memref<32x32xf32, #tpu.memory_space<vmem>>, vector<32x32xf32>
    %cst_18 = arith.constant dense<0.000000e+00> : vector<8x32xf32>
    %34 = tpu.matmul %25, %33, %cst_18 {dimension_numbers = #tpu.dot_dimension_numbers<[1], [0], [0], [1], [0, 0, 1, 1], [], []>} : vector<8x32xf32>, vector<32x32xf32>, vector<8x32xf32> -> vector<8x32xf32>
    %c0_19 = arith.constant 0 : index
    %c0_20 = arith.constant 0 : index
    %35 = vector.load %arg8[%c0_19, %c0_20] : memref<1x32xf32, #tpu.memory_space<vmem>>, vector<1x32xf32>
    %36 = vector.broadcast %35 : vector<1x32xf32> to vector<8x32xf32>
    %37 = arith.addf %34, %36 : vector<8x32xf32>
    %c0_21 = arith.constant 0 : index
    %c0_22 = arith.constant 0 : index
    %38 = vector.load %arg9[%c0_21, %c0_22] : memref<32x32xf32, #tpu.memory_space<vmem>>, vector<32x32xf32>
    %cst_23 = arith.constant dense<0.000000e+00> : vector<8x32xf32>
    %39 = tpu.matmul %25, %38, %cst_23 {dimension_numbers = #tpu.dot_dimension_numbers<[1], [0], [0], [1], [0, 0, 1, 1], [], []>} : vector<8x32xf32>, vector<32x32xf32>, vector<8x32xf32> -> vector<8x32xf32>
    %c0_24 = arith.constant 0 : index
    %c0_25 = arith.constant 0 : index
    %40 = vector.load %arg10[%c0_24, %c0_25] : memref<1x32xf32, #tpu.memory_space<vmem>>, vector<1x32xf32>
    %41 = vector.broadcast %40 : vector<1x32xf32> to vector<8x32xf32>
    %42 = arith.addf %39, %41 : vector<8x32xf32>
    %43 = vector.extract_strided_slice %32 {offsets = [0, 0], sizes = [8, 8], strides = [1, 1]} : vector<8x32xf32> to vector<8x8xf32>
    %c0_26 = arith.constant 0 : index
    %c0_27 = arith.constant 0 : index
    %c0_28 = arith.constant 0 : index
    %44 = vector.load %arg22[%c0_26, %c0_27, %c0_28] : memref<4x8x8xf32, #tpu.memory_space<vmem>>, vector<1x8x8xf32>
    %45 = vector.shape_cast %44 : vector<1x8x8xf32> to vector<8x8xf32>
    %46 = vector.shape_cast %43 : vector<8x8xf32> to vector<1x8x8xf32>
    tpu.vector_store %arg22[%c0_26, %c0_27, %c0_28], %46 {strides = array<i32>} : memref<4x8x8xf32, #tpu.memory_space<vmem>>, vector<1x8x8xf32>,
    %47 = vector.extract_strided_slice %37 {offsets = [0, 0], sizes = [8, 8], strides = [1, 1]} : vector<8x32xf32> to vector<8x8xf32>
    %48 = arith.index_cast %arg1 : i32 to index
    %c0_29 = arith.constant 0 : index
    %c0_30 = arith.constant 0 : index
    %c0_31 = arith.constant 0 : index
    %49 = vector.load %arg20[%48, %c0_29, %c0_30, %c0_31] : memref<1x4x8x8xf32, #tpu.memory_space<vmem>>, vector<1x1x8x8xf32>
    %50 = vector.shape_cast %49 : vector<1x1x8x8xf32> to vector<8x8xf32>
    %51 = vector.shape_cast %47 : vector<8x8xf32> to vector<1x1x8x8xf32>
    tpu.vector_store %arg20[%48, %c0_29, %c0_30, %c0_31], %51 {strides = array<i32>} : memref<1x4x8x8xf32, #tpu.memory_space<vmem>>, vector<1x1x8x8xf32>,
    %52 = vector.extract_strided_slice %42 {offsets = [0, 0], sizes = [8, 8], strides = [1, 1]} : vector<8x32xf32> to vector<8x8xf32>
    %53 = arith.index_cast %arg1 : i32 to index
    %c0_32 = arith.constant 0 : index
    %c0_33 = arith.constant 0 : index
    %c0_34 = arith.constant 0 : index
    %54 = vector.load %arg21[%53, %c0_32, %c0_33, %c0_34] : memref<1x4x8x8xf32, #tpu.memory_space<vmem>>, vector<1x1x8x8xf32>
    %55 = vector.shape_cast %54 : vector<1x1x8x8xf32> to vector<8x8xf32>
    %56 = vector.shape_cast %52 : vector<8x8xf32> to vector<1x1x8x8xf32>
    tpu.vector_store %arg21[%53, %c0_32, %c0_33, %c0_34], %56 {strides = array<i32>} : memref<1x4x8x8xf32, #tpu.memory_space<vmem>>, vector<1x1x8x8xf32>,
    %57 = vector.extract_strided_slice %32 {offsets = [0, 8], sizes = [8, 8], strides = [1, 1]} : vector<8x32xf32> to vector<8x8xf32>
    %c1 = arith.constant 1 : index
    %c0_35 = arith.constant 0 : index
    %c0_36 = arith.constant 0 : index
    %58 = vector.load %arg22[%c1, %c0_35, %c0_36] : memref<4x8x8xf32, #tpu.memory_space<vmem>>, vector<1x8x8xf32>
    %59 = vector.shape_cast %58 : vector<1x8x8xf32> to vector<8x8xf32>
    %60 = vector.shape_cast %57 : vector<8x8xf32> to vector<1x8x8xf32>
    tpu.vector_store %arg22[%c1, %c0_35, %c0_36], %60 {strides = array<i32>} : memref<4x8x8xf32, #tpu.memory_space<vmem>>, vector<1x8x8xf32>,
    %61 = vector.extract_strided_slice %37 {offsets = [0, 8], sizes = [8, 8], strides = [1, 1]} : vector<8x32xf32> to vector<8x8xf32>
    %62 = arith.index_cast %arg1 : i32 to index
    %c1_37 = arith.constant 1 : index
    %c0_38 = arith.constant 0 : index
    %c0_39 = arith.constant 0 : index
    %63 = vector.load %arg20[%62, %c1_37, %c0_38, %c0_39] : memref<1x4x8x8xf32, #tpu.memory_space<vmem>>, vector<1x1x8x8xf32>
    %64 = vector.shape_cast %63 : vector<1x1x8x8xf32> to vector<8x8xf32>
    %65 = vector.shape_cast %61 : vector<8x8xf32> to vector<1x1x8x8xf32>
    tpu.vector_store %arg20[%62, %c1_37, %c0_38, %c0_39], %65 {strides = array<i32>} : memref<1x4x8x8xf32, #tpu.memory_space<vmem>>, vector<1x1x8x8xf32>,
    %66 = vector.extract_strided_slice %42 {offsets = [0, 8], sizes = [8, 8], strides = [1, 1]} : vector<8x32xf32> to vector<8x8xf32>
    %67 = arith.index_cast %arg1 : i32 to index
    %c1_40 = arith.constant 1 : index
    %c0_41 = arith.constant 0 : index
    %c0_42 = arith.constant 0 : index
    %68 = vector.load %arg21[%67, %c1_40, %c0_41, %c0_42] : memref<1x4x8x8xf32, #tpu.memory_space<vmem>>, vector<1x1x8x8xf32>
    %69 = vector.shape_cast %68 : vector<1x1x8x8xf32> to vector<8x8xf32>
    %70 = vector.shape_cast %66 : vector<8x8xf32> to vector<1x1x8x8xf32>
    tpu.vector_store %arg21[%67, %c1_40, %c0_41, %c0_42], %70 {strides = array<i32>} : memref<1x4x8x8xf32, #tpu.memory_space<vmem>>, vector<1x1x8x8xf32>,
    %71 = vector.extract_strided_slice %32 {offsets = [0, 16], sizes = [8, 8], strides = [1, 1]} : vector<8x32xf32> to vector<8x8xf32>
    %c2 = arith.constant 2 : index
    %c0_43 = arith.constant 0 : index
    %c0_44 = arith.constant 0 : index
    %72 = vector.load %arg22[%c2, %c0_43, %c0_44] : memref<4x8x8xf32, #tpu.memory_space<vmem>>, vector<1x8x8xf32>
    %73 = vector.shape_cast %72 : vector<1x8x8xf32> to vector<8x8xf32>
    %74 = vector.shape_cast %71 : vector<8x8xf32> to vector<1x8x8xf32>
    tpu.vector_store %arg22[%c2, %c0_43, %c0_44], %74 {strides = array<i32>} : memref<4x8x8xf32, #tpu.memory_space<vmem>>, vector<1x8x8xf32>,
    %75 = vector.extract_strided_slice %37 {offsets = [0, 16], sizes = [8, 8], strides = [1, 1]} : vector<8x32xf32> to vector<8x8xf32>
    %76 = arith.index_cast %arg1 : i32 to index
    %c2_45 = arith.constant 2 : index
    %c0_46 = arith.constant 0 : index
    %c0_47 = arith.constant 0 : index
    %77 = vector.load %arg20[%76, %c2_45, %c0_46, %c0_47] : memref<1x4x8x8xf32, #tpu.memory_space<vmem>>, vector<1x1x8x8xf32>
    %78 = vector.shape_cast %77 : vector<1x1x8x8xf32> to vector<8x8xf32>
    %79 = vector.shape_cast %75 : vector<8x8xf32> to vector<1x1x8x8xf32>
    tpu.vector_store %arg20[%76, %c2_45, %c0_46, %c0_47], %79 {strides = array<i32>} : memref<1x4x8x8xf32, #tpu.memory_space<vmem>>, vector<1x1x8x8xf32>,
    %80 = vector.extract_strided_slice %42 {offsets = [0, 16], sizes = [8, 8], strides = [1, 1]} : vector<8x32xf32> to vector<8x8xf32>
    %81 = arith.index_cast %arg1 : i32 to index
    %c2_48 = arith.constant 2 : index
    %c0_49 = arith.constant 0 : index
    %c0_50 = arith.constant 0 : index
    %82 = vector.load %arg21[%81, %c2_48, %c0_49, %c0_50] : memref<1x4x8x8xf32, #tpu.memory_space<vmem>>, vector<1x1x8x8xf32>
    %83 = vector.shape_cast %82 : vector<1x1x8x8xf32> to vector<8x8xf32>
    %84 = vector.shape_cast %80 : vector<8x8xf32> to vector<1x1x8x8xf32>
    tpu.vector_store %arg21[%81, %c2_48, %c0_49, %c0_50], %84 {strides = array<i32>} : memref<1x4x8x8xf32, #tpu.memory_space<vmem>>, vector<1x1x8x8xf32>,
    %85 = vector.extract_strided_slice %32 {offsets = [0, 24], sizes = [8, 8], strides = [1, 1]} : vector<8x32xf32> to vector<8x8xf32>
    %c3 = arith.constant 3 : index
    %c0_51 = arith.constant 0 : index
    %c0_52 = arith.constant 0 : index
    %86 = vector.load %arg22[%c3, %c0_51, %c0_52] : memref<4x8x8xf32, #tpu.memory_space<vmem>>, vector<1x8x8xf32>
    %87 = vector.shape_cast %86 : vector<1x8x8xf32> to vector<8x8xf32>
    %88 = vector.shape_cast %85 : vector<8x8xf32> to vector<1x8x8xf32>
    tpu.vector_store %arg22[%c3, %c0_51, %c0_52], %88 {strides = array<i32>} : memref<4x8x8xf32, #tpu.memory_space<vmem>>, vector<1x8x8xf32>,
    %89 = vector.extract_strided_slice %37 {offsets = [0, 24], sizes = [8, 8], strides = [1, 1]} : vector<8x32xf32> to vector<8x8xf32>
    %90 = arith.index_cast %arg1 : i32 to index
    %c3_53 = arith.constant 3 : index
    %c0_54 = arith.constant 0 : index
    %c0_55 = arith.constant 0 : index
    %91 = vector.load %arg20[%90, %c3_53, %c0_54, %c0_55] : memref<1x4x8x8xf32, #tpu.memory_space<vmem>>, vector<1x1x8x8xf32>
    %92 = vector.shape_cast %91 : vector<1x1x8x8xf32> to vector<8x8xf32>
    %93 = vector.shape_cast %89 : vector<8x8xf32> to vector<1x1x8x8xf32>
    tpu.vector_store %arg20[%90, %c3_53, %c0_54, %c0_55], %93 {strides = array<i32>} : memref<1x4x8x8xf32, #tpu.memory_space<vmem>>, vector<1x1x8x8xf32>,
    %94 = vector.extract_strided_slice %42 {offsets = [0, 24], sizes = [8, 8], strides = [1, 1]} : vector<8x32xf32> to vector<8x8xf32>
    %95 = arith.index_cast %arg1 : i32 to index
    %c3_56 = arith.constant 3 : index
    %c0_57 = arith.constant 0 : index
    %c0_58 = arith.constant 0 : index
    %96 = vector.load %arg21[%95, %c3_56, %c0_57, %c0_58] : memref<1x4x8x8xf32, #tpu.memory_space<vmem>>, vector<1x1x8x8xf32>
    %97 = vector.shape_cast %96 : vector<1x1x8x8xf32> to vector<8x8xf32>
    %98 = vector.shape_cast %94 : vector<8x8xf32> to vector<1x1x8x8xf32>
    tpu.vector_store %arg21[%95, %c3_56, %c0_57, %c0_58], %98 {strides = array<i32>} : memref<1x4x8x8xf32, #tpu.memory_space<vmem>>, vector<1x1x8x8xf32>,
    %c0_59 = arith.constant 0 : index
    %c0_60 = arith.constant 0 : index
    %c0_61 = arith.constant 0 : index
    %99 = vector.load %arg22[%c0_59, %c0_60, %c0_61] : memref<4x8x8xf32, #tpu.memory_space<vmem>>, vector<4x8x8xf32>
    %cst_62 = arith.constant -1.000000e+30 : f32
    %100 = vector.broadcast %cst_62 : f32 to vector<4x8x1xf32>
    %c0_63 = arith.constant 0 : index
    %c0_64 = arith.constant 0 : index
    %c0_65 = arith.constant 0 : index
    %101 = vector.load %arg24[%c0_63, %c0_64, %c0_65] : memref<4x8x1xf32, #tpu.memory_space<vmem>>, vector<4x8x1xf32>
    tpu.vector_store %arg24[%c0_63, %c0_64, %c0_65], %100 {strides = array<i32>} : memref<4x8x1xf32, #tpu.memory_space<vmem>>, vector<4x8x1xf32>,
    %cst_66 = arith.constant 0.000000e+00 : f32
    %102 = vector.broadcast %cst_66 : f32 to vector<4x8x1xf32>
    %c0_67 = arith.constant 0 : index
    %c0_68 = arith.constant 0 : index
    %c0_69 = arith.constant 0 : index
    %103 = vector.load %arg25[%c0_67, %c0_68, %c0_69] : memref<4x8x1xf32, #tpu.memory_space<vmem>>, vector<4x8x1xf32>
    tpu.vector_store %arg25[%c0_67, %c0_68, %c0_69], %102 {strides = array<i32>} : memref<4x8x1xf32, #tpu.memory_space<vmem>>, vector<4x8x1xf32>,
    %cst_70 = arith.constant 0.000000e+00 : f32
    %104 = vector.broadcast %cst_70 : f32 to vector<4x8x8xf32>
    %c0_71 = arith.constant 0 : index
    %c0_72 = arith.constant 0 : index
    %c0_73 = arith.constant 0 : index
    %105 = vector.load %arg26[%c0_71, %c0_72, %c0_73] : memref<4x8x8xf32, #tpu.memory_space<vmem>>, vector<4x8x8xf32>
    tpu.vector_store %arg26[%c0_71, %c0_72, %c0_73], %104 {strides = array<i32>} : memref<4x8x8xf32, #tpu.memory_space<vmem>>, vector<4x8x8xf32>,
    %c0_i32 = arith.constant 0 : i32
    %106 = arith.subi %arg1, %c0_i32 : i32
    %c1_i32 = arith.constant 1 : i32
    %c1_i32_74 = arith.constant 1 : i32
    %107 = arith.subi %c1_i32, %c1_i32_74 : i32
    %108 = arith.addi %106, %107 : i32
    %c1_i32_75 = arith.constant 1 : i32
    %109 = arith.divsi %108, %c1_i32_75 : i32
    %c1_i32_76 = arith.constant 1 : i32
    %c0_i32_77 = arith.constant 0 : i32
    %c0_i32_78 = arith.constant 0 : i32
    %110 = arith.subi %109, %c0_i32_78 : i32
    %111 = arith.addi %c0_i32_78, %110 : i32
    %c1_i32_79 = arith.constant 1 : i32
    scf.for %arg27 = %c0_i32_78 to %111 step %c1_i32_79  : i32 {
      %232 = arith.muli %arg27, %c1_i32_76 : i32
      %233 = arith.addi %c0_i32_77, %232 : i32
      %234 = arith.index_cast %233 : i32 to index
      %c0_156 = arith.constant 0 : index
      %c0_157 = arith.constant 0 : index
      %c0_158 = arith.constant 0 : index
      %235 = vector.load %arg20[%234, %c0_156, %c0_157, %c0_158] : memref<1x4x8x8xf32, #tpu.memory_space<vmem>>, vector<1x4x8x8xf32>
      %236 = vector.shape_cast %235 : vector<1x4x8x8xf32> to vector<4x8x8xf32>
      %237 = arith.index_cast %233 : i32 to index
      %c0_159 = arith.constant 0 : index
      %c0_160 = arith.constant 0 : index
      %c0_161 = arith.constant 0 : index
      %238 = vector.load %arg21[%237, %c0_159, %c0_160, %c0_161] : memref<1x4x8x8xf32, #tpu.memory_space<vmem>>, vector<1x4x8x8xf32>
      %239 = vector.shape_cast %238 : vector<1x4x8x8xf32> to vector<4x8x8xf32>
      "tpu.trace_start"() <{level = 10 : i32, message = "hqd,hkd->hqk"}> : () -> ()
      %cst_162 = arith.constant dense<0.000000e+00> : vector<4x8x8xf32>
      %240 = tpu.matmul %99, %236, %cst_162 {dimension_numbers = #tpu.dot_dimension_numbers<[2], [2], [1], [1], [0, 0, 0, 1, 1, 1], [0], [0]>} : vector<4x8x8xf32>, vector<4x8x8xf32>, vector<4x8x8xf32> -> vector<4x8x8xf32>
      "tpu.trace_stop"() : () -> ()
      %c0_163 = arith.constant 0 : index
      %c0_164 = arith.constant 0 : index
      %c0_165 = arith.constant 0 : index
      %241 = vector.load %arg24[%c0_163, %c0_164, %c0_165] : memref<4x8x1xf32, #tpu.memory_space<vmem>>, vector<4x8x1xf32>
      %cst_166 = arith.constant dense<0xFF800000> : vector<4x8xf32>
      %242 = vector.multi_reduction <maximumf>, %240, %cst_166 [2] : vector<4x8x8xf32> to vector<4x8xf32>
      %243 = vector.shape_cast %242 : vector<4x8xf32> to vector<4x8x1xf32>
      %244 = arith.maximumf %241, %243 : vector<4x8x1xf32>
      %245 = arith.subf %241, %244 : vector<4x8x1xf32>
      %246 = math.exp %245 : vector<4x8x1xf32>
      %247 = vector.broadcast %244 : vector<4x8x1xf32> to vector<4x8x8xf32>
      %248 = arith.subf %240, %247 : vector<4x8x8xf32>
      %249 = math.exp %248 : vector<4x8x8xf32>
      %c0_167 = arith.constant 0 : index
      %c0_168 = arith.constant 0 : index
      %c0_169 = arith.constant 0 : index
      %250 = vector.load %arg25[%c0_167, %c0_168, %c0_169] : memref<4x8x1xf32, #tpu.memory_space<vmem>>, vector<4x8x1xf32>
      %251 = arith.mulf %246, %250 : vector<4x8x1xf32>
      %cst_170 = arith.constant dense<0.000000e+00> : vector<4x8xf32>
      %252 = vector.multi_reduction <add>, %249, %cst_170 [2] : vector<4x8x8xf32> to vector<4x8xf32>
      %253 = vector.shape_cast %252 : vector<4x8xf32> to vector<4x8x1xf32>
      %254 = arith.addf %251, %253 : vector<4x8x1xf32>
      %c0_171 = arith.constant 0 : index
      %c0_172 = arith.constant 0 : index
      %c0_173 = arith.constant 0 : index
      %255 = vector.load %arg25[%c0_171, %c0_172, %c0_173] : memref<4x8x1xf32, #tpu.memory_space<vmem>>, vector<4x8x1xf32>
      tpu.vector_store %arg25[%c0_171, %c0_172, %c0_173], %254 {strides = array<i32>} : memref<4x8x1xf32, #tpu.memory_space<vmem>>, vector<4x8x1xf32>,
      %c0_174 = arith.constant 0 : index
      %c0_175 = arith.constant 0 : index
      %c0_176 = arith.constant 0 : index
      %256 = vector.load %arg26[%c0_174, %c0_175, %c0_176] : memref<4x8x8xf32, #tpu.memory_space<vmem>>, vector<4x8x8xf32>
      %257 = vector.broadcast %246 : vector<4x8x1xf32> to vector<4x8x8xf32>
      %258 = arith.mulf %257, %256 : vector<4x8x8xf32>
      "tpu.trace_start"() <{level = 10 : i32, message = "hqk,hkd->hqd"}> : () -> ()
      %cst_177 = arith.constant dense<0.000000e+00> : vector<4x8x8xf32>
      %259 = tpu.matmul %249, %239, %cst_177 {dimension_numbers = #tpu.dot_dimension_numbers<[2], [1], [1], [2], [0, 0, 0, 1, 1, 2], [0], [0]>} : vector<4x8x8xf32>, vector<4x8x8xf32>, vector<4x8x8xf32> -> vector<4x8x8xf32>
      "tpu.trace_stop"() : () -> ()
      %260 = arith.addf %258, %259 : vector<4x8x8xf32>
      %c0_178 = arith.constant 0 : index
      %c0_179 = arith.constant 0 : index
      %c0_180 = arith.constant 0 : index
      %261 = vector.load %arg26[%c0_178, %c0_179, %c0_180] : memref<4x8x8xf32, #tpu.memory_space<vmem>>, vector<4x8x8xf32>
      tpu.vector_store %arg26[%c0_178, %c0_179, %c0_180], %260 {strides = array<i32>} : memref<4x8x8xf32, #tpu.memory_space<vmem>>, vector<4x8x8xf32>,
      %c0_181 = arith.constant 0 : index
      %c0_182 = arith.constant 0 : index
      %c0_183 = arith.constant 0 : index
      %262 = vector.load %arg24[%c0_181, %c0_182, %c0_183] : memref<4x8x1xf32, #tpu.memory_space<vmem>>, vector<4x8x1xf32>
      tpu.vector_store %arg24[%c0_181, %c0_182, %c0_183], %244 {strides = array<i32>} : memref<4x8x1xf32, #tpu.memory_space<vmem>>, vector<4x8x1xf32>,
    }
    %112 = tpu.iota {dimensions = array<i32: 0>} : vector<8x8xi32>
    %113 = tpu.iota {dimensions = array<i32: 1>} : vector<8x8xi32>
    %114 = arith.index_cast %arg1 : i32 to index
    %c0_80 = arith.constant 0 : index
    %c0_81 = arith.constant 0 : index
    %c0_82 = arith.constant 0 : index
    %115 = vector.load %arg20[%114, %c0_80, %c0_81, %c0_82] : memref<1x4x8x8xf32, #tpu.memory_space<vmem>>, vector<1x4x8x8xf32>
    %116 = vector.shape_cast %115 : vector<1x4x8x8xf32> to vector<4x8x8xf32>
    %117 = arith.index_cast %arg1 : i32 to index
    %c0_83 = arith.constant 0 : index
    %c0_84 = arith.constant 0 : index
    %c0_85 = arith.constant 0 : index
    %118 = vector.load %arg21[%117, %c0_83, %c0_84, %c0_85] : memref<1x4x8x8xf32, #tpu.memory_space<vmem>>, vector<1x4x8x8xf32>
    %119 = vector.shape_cast %118 : vector<1x4x8x8xf32> to vector<4x8x8xf32>
    %120 = arith.cmpi sge, %112, %113 : vector<8x8xi32>
    %121 = vector.shape_cast %120 : vector<8x8xi1> to vector<1x8x8xi1>
    "tpu.trace_start"() <{level = 10 : i32, message = "hqd,hkd->hqk"}> : () -> ()
    %cst_86 = arith.constant dense<0.000000e+00> : vector<4x8x8xf32>
    %122 = tpu.matmul %99, %116, %cst_86 {dimension_numbers = #tpu.dot_dimension_numbers<[2], [2], [1], [1], [0, 0, 0, 1, 1, 1], [0], [0]>} : vector<4x8x8xf32>, vector<4x8x8xf32>, vector<4x8x8xf32> -> vector<4x8x8xf32>
    %cst_87 = arith.constant -1.000000e+30 : f32
    "tpu.trace_stop"() : () -> ()
    %123 = vector.shape_cast %121 : vector<1x8x8xi1> to vector<1x8x8xi1>
    %124 = vector.broadcast %123 : vector<1x8x8xi1> to vector<4x8x8xi1>
    %125 = vector.broadcast %cst_87 : f32 to vector<4x8x8xf32>
    %126 = arith.select %124, %122, %125 : vector<4x8x8xi1>, vector<4x8x8xf32>
    %c0_88 = arith.constant 0 : index
    %c0_89 = arith.constant 0 : index
    %c0_90 = arith.constant 0 : index
    %127 = vector.load %arg24[%c0_88, %c0_89, %c0_90] : memref<4x8x1xf32, #tpu.memory_space<vmem>>, vector<4x8x1xf32>
    %cst_91 = arith.constant dense<0xFF800000> : vector<4x8xf32>
    %128 = vector.multi_reduction <maximumf>, %126, %cst_91 [2] : vector<4x8x8xf32> to vector<4x8xf32>
    %129 = vector.shape_cast %128 : vector<4x8xf32> to vector<4x8x1xf32>
    %130 = arith.maximumf %127, %129 : vector<4x8x1xf32>
    %131 = arith.subf %127, %130 : vector<4x8x1xf32>
    %132 = math.exp %131 : vector<4x8x1xf32>
    %133 = vector.broadcast %130 : vector<4x8x1xf32> to vector<4x8x8xf32>
    %134 = arith.subf %126, %133 : vector<4x8x8xf32>
    %135 = math.exp %134 : vector<4x8x8xf32>
    %c0_92 = arith.constant 0 : index
    %c0_93 = arith.constant 0 : index
    %c0_94 = arith.constant 0 : index
    %136 = vector.load %arg25[%c0_92, %c0_93, %c0_94] : memref<4x8x1xf32, #tpu.memory_space<vmem>>, vector<4x8x1xf32>
    %137 = arith.mulf %132, %136 : vector<4x8x1xf32>
    %cst_95 = arith.constant dense<0.000000e+00> : vector<4x8xf32>
    %138 = vector.multi_reduction <add>, %135, %cst_95 [2] : vector<4x8x8xf32> to vector<4x8xf32>
    %139 = vector.shape_cast %138 : vector<4x8xf32> to vector<4x8x1xf32>
    %140 = arith.addf %137, %139 : vector<4x8x1xf32>
    %c0_96 = arith.constant 0 : index
    %c0_97 = arith.constant 0 : index
    %c0_98 = arith.constant 0 : index
    %141 = vector.load %arg25[%c0_96, %c0_97, %c0_98] : memref<4x8x1xf32, #tpu.memory_space<vmem>>, vector<4x8x1xf32>
    tpu.vector_store %arg25[%c0_96, %c0_97, %c0_98], %140 {strides = array<i32>} : memref<4x8x1xf32, #tpu.memory_space<vmem>>, vector<4x8x1xf32>,
    %c0_99 = arith.constant 0 : index
    %c0_100 = arith.constant 0 : index
    %c0_101 = arith.constant 0 : index
    %142 = vector.load %arg26[%c0_99, %c0_100, %c0_101] : memref<4x8x8xf32, #tpu.memory_space<vmem>>, vector<4x8x8xf32>
    %143 = vector.broadcast %132 : vector<4x8x1xf32> to vector<4x8x8xf32>
    %144 = arith.mulf %143, %142 : vector<4x8x8xf32>
    "tpu.trace_start"() <{level = 10 : i32, message = "hqk,hkd->hqd"}> : () -> ()
    %cst_102 = arith.constant dense<0.000000e+00> : vector<4x8x8xf32>
    %145 = tpu.matmul %135, %119, %cst_102 {dimension_numbers = #tpu.dot_dimension_numbers<[2], [1], [1], [2], [0, 0, 0, 1, 1, 2], [0], [0]>} : vector<4x8x8xf32>, vector<4x8x8xf32>, vector<4x8x8xf32> -> vector<4x8x8xf32>
    "tpu.trace_stop"() : () -> ()
    %146 = arith.addf %144, %145 : vector<4x8x8xf32>
    %c0_103 = arith.constant 0 : index
    %c0_104 = arith.constant 0 : index
    %c0_105 = arith.constant 0 : index
    %147 = vector.load %arg26[%c0_103, %c0_104, %c0_105] : memref<4x8x8xf32, #tpu.memory_space<vmem>>, vector<4x8x8xf32>
    tpu.vector_store %arg26[%c0_103, %c0_104, %c0_105], %146 {strides = array<i32>} : memref<4x8x8xf32, #tpu.memory_space<vmem>>, vector<4x8x8xf32>,
    %c0_106 = arith.constant 0 : index
    %c0_107 = arith.constant 0 : index
    %c0_108 = arith.constant 0 : index
    %148 = vector.load %arg24[%c0_106, %c0_107, %c0_108] : memref<4x8x1xf32, #tpu.memory_space<vmem>>, vector<4x8x1xf32>
    tpu.vector_store %arg24[%c0_106, %c0_107, %c0_108], %130 {strides = array<i32>} : memref<4x8x1xf32, #tpu.memory_space<vmem>>, vector<4x8x1xf32>,
    %c0_109 = arith.constant 0 : index
    %c0_110 = arith.constant 0 : index
    %c0_111 = arith.constant 0 : index
    %149 = vector.load %arg25[%c0_109, %c0_110, %c0_111] : memref<4x8x1xf32, #tpu.memory_space<vmem>>, vector<4x8x1xf32>
    %150 = tpu.reciprocal %149 {approx = true} : vector<4x8x1xf32> -> vector<4x8x1xf32>
    %c0_112 = arith.constant 0 : index
    %c0_113 = arith.constant 0 : index
    %c0_114 = arith.constant 0 : index
    %151 = vector.load %arg26[%c0_112, %c0_113, %c0_114] : memref<4x8x8xf32, #tpu.memory_space<vmem>>, vector<4x8x8xf32>
    %152 = vector.broadcast %150 : vector<4x8x1xf32> to vector<4x8x8xf32>
    %153 = arith.mulf %151, %152 : vector<4x8x8xf32>
    %154 = vector.extract_strided_slice %153 {offsets = [0, 0, 0], sizes = [1, 8, 8], strides = [1, 1, 1]} : vector<4x8x8xf32> to vector<1x8x8xf32>
    %155 = vector.shape_cast %154 : vector<1x8x8xf32> to vector<8x8xf32>
    %c0_115 = arith.constant 0 : index
    %c0_116 = arith.constant 0 : index
    %156 = vector.load %arg23[%c0_115, %c0_116] : memref<8x32xf32, #tpu.memory_space<vmem>>, vector<8x8xf32>
    tpu.vector_store %arg23[%c0_115, %c0_116], %155 {strides = array<i32>} : memref<8x32xf32, #tpu.memory_space<vmem>>, vector<8x8xf32>,
    %157 = vector.extract_strided_slice %153 {offsets = [1, 0, 0], sizes = [1, 8, 8], strides = [1, 1, 1]} : vector<4x8x8xf32> to vector<1x8x8xf32>
    %158 = vector.shape_cast %157 : vector<1x8x8xf32> to vector<8x8xf32>
    %c0_117 = arith.constant 0 : index
    %c8 = arith.constant 8 : index
    %159 = vector.load %arg23[%c0_117, %c8] : memref<8x32xf32, #tpu.memory_space<vmem>>, vector<8x8xf32>
    tpu.vector_store %arg23[%c0_117, %c8], %158 {strides = array<i32>} : memref<8x32xf32, #tpu.memory_space<vmem>>, vector<8x8xf32>,
    %160 = vector.extract_strided_slice %153 {offsets = [2, 0, 0], sizes = [1, 8, 8], strides = [1, 1, 1]} : vector<4x8x8xf32> to vector<1x8x8xf32>
    %161 = vector.shape_cast %160 : vector<1x8x8xf32> to vector<8x8xf32>
    %c0_118 = arith.constant 0 : index
    %c16 = arith.constant 16 : index
    %162 = vector.load %arg23[%c0_118, %c16] : memref<8x32xf32, #tpu.memory_space<vmem>>, vector<8x8xf32>
    tpu.vector_store %arg23[%c0_118, %c16], %161 {strides = array<i32>} : memref<8x32xf32, #tpu.memory_space<vmem>>, vector<8x8xf32>,
    %163 = vector.extract_strided_slice %153 {offsets = [3, 0, 0], sizes = [1, 8, 8], strides = [1, 1, 1]} : vector<4x8x8xf32> to vector<1x8x8xf32>
    %164 = vector.shape_cast %163 : vector<1x8x8xf32> to vector<8x8xf32>
    %c0_119 = arith.constant 0 : index
    %c24 = arith.constant 24 : index
    %165 = vector.load %arg23[%c0_119, %c24] : memref<8x32xf32, #tpu.memory_space<vmem>>, vector<8x8xf32>
    tpu.vector_store %arg23[%c0_119, %c24], %164 {strides = array<i32>} : memref<8x32xf32, #tpu.memory_space<vmem>>, vector<8x8xf32>,
    %c0_120 = arith.constant 0 : index
    %c0_121 = arith.constant 0 : index
    %166 = vector.load %arg23[%c0_120, %c0_121] : memref<8x32xf32, #tpu.memory_space<vmem>>, vector<8x32xf32>
    %c0_122 = arith.constant 0 : index
    %c0_123 = arith.constant 0 : index
    %167 = vector.load %arg11[%c0_122, %c0_123] : memref<32x32xf32, #tpu.memory_space<vmem>>, vector<32x32xf32>
    %cst_124 = arith.constant dense<0.000000e+00> : vector<8x32xf32>
    %168 = tpu.matmul %166, %167, %cst_124 {dimension_numbers = #tpu.dot_dimension_numbers<[1], [0], [0], [1], [0, 0, 1, 1], [], []>} : vector<8x32xf32>, vector<32x32xf32>, vector<8x32xf32> -> vector<8x32xf32>
    %c0_125 = arith.constant 0 : index
    %c0_126 = arith.constant 0 : index
    %169 = vector.load %arg12[%c0_125, %c0_126] : memref<1x32xf32, #tpu.memory_space<vmem>>, vector<1x32xf32>
    %170 = vector.broadcast %169 : vector<1x32xf32> to vector<8x32xf32>
    %171 = arith.addf %168, %170 : vector<8x32xf32>
    %172 = arith.addf %1, %171 : vector<8x32xf32>
    %c0_127 = arith.constant 0 : index
    %c0_128 = arith.constant 0 : index
    %173 = vector.load %arg13[%c0_127, %c0_128] : memref<1x32xf32, #tpu.memory_space<vmem>>, vector<1x32xf32>
    %c0_129 = arith.constant 0 : index
    %c0_130 = arith.constant 0 : index
    %174 = vector.load %arg14[%c0_129, %c0_130] : memref<1x32xf32, #tpu.memory_space<vmem>>, vector<1x32xf32>
    %cst_131 = arith.constant dense<0.000000e+00> : vector<8xf32>
    %175 = vector.multi_reduction <add>, %172, %cst_131 [1] : vector<8x32xf32> to vector<8xf32>
    %176 = vector.shape_cast %175 : vector<8xf32> to vector<8x1xf32>
    %cst_132 = arith.constant 3.200000e+01 : f32
    %177 = vector.broadcast %cst_132 : f32 to vector<8x1xf32>
    %178 = arith.divf %176, %177 : vector<8x1xf32>
    %179 = vector.broadcast %178 : vector<8x1xf32> to vector<8x32xf32>
    %180 = arith.subf %172, %179 : vector<8x32xf32>
    %181 = arith.mulf %180, %180 : vector<8x32xf32>
    %cst_133 = arith.constant dense<0.000000e+00> : vector<8xf32>
    %182 = vector.multi_reduction <add>, %181, %cst_133 [1] : vector<8x32xf32> to vector<8xf32>
    %183 = vector.shape_cast %182 : vector<8xf32> to vector<8x1xf32>
    %cst_134 = arith.constant 3.200000e+01 : f32
    %184 = vector.broadcast %cst_134 : f32 to vector<8x1xf32>
    %185 = arith.divf %183, %184 : vector<8x1xf32>
    %186 = vector.broadcast %178 : vector<8x1xf32> to vector<8x32xf32>
    %187 = arith.subf %172, %186 : vector<8x32xf32>
    %cst_135 = arith.constant 9.99999974E-6 : f32
    %188 = vector.broadcast %cst_135 : f32 to vector<8x1xf32>
    %189 = arith.addf %185, %188 : vector<8x1xf32>
    %190 = math.rsqrt %189 : vector<8x1xf32>
    %191 = vector.broadcast %190 : vector<8x1xf32> to vector<8x32xf32>
    %192 = arith.mulf %187, %191 : vector<8x32xf32>
    %193 = vector.broadcast %173 : vector<1x32xf32> to vector<8x32xf32>
    %194 = arith.mulf %192, %193 : vector<8x32xf32>
    %195 = vector.broadcast %174 : vector<1x32xf32> to vector<8x32xf32>
    %196 = arith.addf %194, %195 : vector<8x32xf32>
    %cst_136 = arith.constant 0.000000e+00 : f32
    %197 = vector.broadcast %cst_136 : f32 to vector<8x32xf32>
    %c0_i32_137 = arith.constant 0 : i32
    %198 = arith.index_cast %c0_i32_137 : i32 to index
    %c0_138 = arith.constant 0 : index
    %c0_139 = arith.constant 0 : index
    %199 = vector.load %arg15[%198, %c0_138, %c0_139] : memref<1x32x128xf32, #tpu.memory_space<vmem>>, vector<1x32x128xf32>
    %200 = vector.shape_cast %199 : vector<1x32x128xf32> to vector<32x128xf32>
    %cst_140 = arith.constant dense<0.000000e+00> : vector<8x128xf32>
    %201 = tpu.matmul %196, %200, %cst_140 {dimension_numbers = #tpu.dot_dimension_numbers<[1], [0], [0], [1], [0, 0, 1, 1], [], []>} : vector<8x32xf32>, vector<32x128xf32>, vector<8x128xf32> -> vector<8x128xf32>
    %202 = arith.index_cast %c0_i32_137 : i32 to index
    %c0_141 = arith.constant 0 : index
    %c0_142 = arith.constant 0 : index
    %203 = vector.load %arg16[%202, %c0_141, %c0_142] : memref<1x1x128xf32, #tpu.memory_space<vmem>>, vector<1x1x128xf32>
    %204 = vector.shape_cast %203 : vector<1x1x128xf32> to vector<1x128xf32>
    %205 = vector.broadcast %204 : vector<1x128xf32> to vector<8x128xf32>
    %206 = arith.addf %201, %205 : vector<8x128xf32>
    %207 = arith.mulf %206, %206 : vector<8x128xf32>
    %208 = arith.mulf %206, %207 : vector<8x128xf32>
    %cst_143 = arith.constant 4.471500e-02 : f32
    %209 = vector.broadcast %cst_143 : f32 to vector<8x128xf32>
    %210 = arith.mulf %209, %208 : vector<8x128xf32>
    %211 = arith.addf %206, %210 : vector<8x128xf32>
    %cst_144 = arith.constant 0.797884583 : f32
    %212 = vector.broadcast %cst_144 : f32 to vector<8x128xf32>
    %213 = arith.mulf %212, %211 : vector<8x128xf32>
    %214 = math.tanh %213 : vector<8x128xf32>
    %cst_145 = arith.constant 1.000000e+00 : f32
    %215 = vector.broadcast %cst_145 : f32 to vector<8x128xf32>
    %216 = arith.addf %215, %214 : vector<8x128xf32>
    %cst_146 = arith.constant 5.000000e-01 : f32
    %217 = vector.broadcast %cst_146 : f32 to vector<8x128xf32>
    %218 = arith.mulf %217, %216 : vector<8x128xf32>
    %219 = arith.mulf %206, %218 : vector<8x128xf32>
    %220 = arith.index_cast %c0_i32_137 : i32 to index
    %c0_147 = arith.constant 0 : index
    %c0_148 = arith.constant 0 : index
    %221 = vector.load %arg17[%220, %c0_147, %c0_148] : memref<1x128x32xf32, #tpu.memory_space<vmem>>, vector<1x128x32xf32>
    %222 = vector.shape_cast %221 : vector<1x128x32xf32> to vector<128x32xf32>
    %cst_149 = arith.constant dense<0.000000e+00> : vector<8x32xf32>
    %223 = tpu.matmul %219, %222, %cst_149 {dimension_numbers = #tpu.dot_dimension_numbers<[1], [0], [0], [1], [0, 0, 1, 1], [], []>} : vector<8x128xf32>, vector<128x32xf32>, vector<8x32xf32> -> vector<8x32xf32>
    %224 = arith.addf %197, %223 : vector<8x32xf32>
    %c1_i32_150 = arith.constant 1 : i32
    %c0_151 = arith.constant 0 : index
    %c0_152 = arith.constant 0 : index
    %225 = vector.load %arg18[%c0_151, %c0_152] : memref<1x32xf32, #tpu.memory_space<vmem>>, vector<1x32xf32>
    %226 = vector.broadcast %225 : vector<1x32xf32> to vector<8x32xf32>
    %227 = arith.addf %224, %226 : vector<8x32xf32>
    %228 = arith.addf %172, %227 : vector<8x32xf32>
    %c0_153 = arith.constant 0 : index
    %c0_154 = arith.constant 0 : index
    %c0_155 = arith.constant 0 : index
    %229 = vector.load %arg19[%c0_153, %c0_154, %c0_155] : memref<1x8x32xf32, #tpu.memory_space<vmem>>, vector<1x8x32xf32>
    %230 = vector.shape_cast %229 : vector<1x8x32xf32> to vector<8x32xf32>
    %231 = vector.shape_cast %228 : vector<8x32xf32> to vector<1x8x32xf32>
    tpu.vector_store %arg19[%c0_153, %c0_154, %c0_155], %231 {strides = array<i32>} : memref<1x8x32xf32, #tpu.memory_space<vmem>>, vector<1x8x32xf32>,
    return
  }
  func.func @transform_0(%arg0: i32, %arg1: i32) -> (i32, i32, i32) {
    %c0_i32 = arith.constant 0 : i32
    %c0_i32_0 = arith.constant 0 : i32
    return %arg0, %arg1, %c0_i32 : i32, i32, i32
  }
  func.func @transform_1(%arg0: i32, %arg1: i32) -> (i32, i32) {
    %c0_i32 = arith.constant 0 : i32
    %c0_i32_0 = arith.constant 0 : i32
    %c0_i32_1 = arith.constant 0 : i32
    return %c0_i32, %c0_i32_0 : i32, i32
  }
  func.func @transform_2(%arg0: i32, %arg1: i32) -> (i32, i32) {
    %c0_i32 = arith.constant 0 : i32
    %c0_i32_0 = arith.constant 0 : i32
    %c0_i32_1 = arith.constant 0 : i32
    return %c0_i32, %c0_i32_0 : i32, i32
  }
  func.func @transform_3(%arg0: i32, %arg1: i32) -> (i32, i32) {
    %c0_i32 = arith.constant 0 : i32
    %c0_i32_0 = arith.constant 0 : i32
    %c0_i32_1 = arith.constant 0 : i32
    return %c0_i32, %c0_i32_0 : i32, i32
  }
  func.func @transform_4(%arg0: i32, %arg1: i32) -> (i32, i32) {
    %c0_i32 = arith.constant 0 : i32
    %c0_i32_0 = arith.constant 0 : i32
    %c0_i32_1 = arith.constant 0 : i32
    return %c0_i32, %c0_i32_0 : i32, i32
  }
  func.func @transform_5(%arg0: i32, %arg1: i32) -> (i32, i32) {
    %c0_i32 = arith.constant 0 : i32
    %c0_i32_0 = arith.constant 0 : i32
    %c0_i32_1 = arith.constant 0 : i32
    return %c0_i32, %c0_i32_0 : i32, i32
  }
  func.func @transform_6(%arg0: i32, %arg1: i32) -> (i32, i32) {
    %c0_i32 = arith.constant 0 : i32
    %c0_i32_0 = arith.constant 0 : i32
    %c0_i32_1 = arith.constant 0 : i32
    return %c0_i32, %c0_i32_0 : i32, i32
  }
  func.func @transform_7(%arg0: i32, %arg1: i32) -> (i32, i32) {
    %c0_i32 = arith.constant 0 : i32
    %c0_i32_0 = arith.constant 0 : i32
    %c0_i32_1 = arith.constant 0 : i32
    return %c0_i32, %c0_i32_0 : i32, i32
  }
  func.func @transform_8(%arg0: i32, %arg1: i32) -> (i32, i32) {
    %c0_i32 = arith.constant 0 : i32
    %c0_i32_0 = arith.constant 0 : i32
    %c0_i32_1 = arith.constant 0 : i32
    return %c0_i32, %c0_i32_0 : i32, i32
  }
  func.func @transform_9(%arg0: i32, %arg1: i32) -> (i32, i32) {
    %c0_i32 = arith.constant 0 : i32
    %c0_i32_0 = arith.constant 0 : i32
    %c0_i32_1 = arith.constant 0 : i32
    return %c0_i32, %c0_i32_0 : i32, i32
  }
  func.func @transform_10(%arg0: i32, %arg1: i32) -> (i32, i32) {
    %c0_i32 = arith.constant 0 : i32
    %c0_i32_0 = arith.constant 0 : i32
    %c0_i32_1 = arith.constant 0 : i32
    return %c0_i32, %c0_i32_0 : i32, i32
  }
  func.func @transform_11(%arg0: i32, %arg1: i32) -> (i32, i32) {
    %c0_i32 = arith.constant 0 : i32
    %c0_i32_0 = arith.constant 0 : i32
    %c0_i32_1 = arith.constant 0 : i32
    return %c0_i32, %c0_i32_0 : i32, i32
  }
  func.func @transform_12(%arg0: i32, %arg1: i32) -> (i32, i32) {
    %c0_i32 = arith.constant 0 : i32
    %c0_i32_0 = arith.constant 0 : i32
    %c0_i32_1 = arith.constant 0 : i32
    return %c0_i32, %c0_i32_0 : i32, i32
  }
  func.func @transform_13(%arg0: i32, %arg1: i32) -> (i32, i32, i32) {
    %c0_i32 = arith.constant 0 : i32
    %c0_i32_0 = arith.constant 0 : i32
    %c0_i32_1 = arith.constant 0 : i32
    %c0_i32_2 = arith.constant 0 : i32
    return %c0_i32, %c0_i32_0, %c0_i32_1 : i32, i32, i32
  }
  func.func @transform_14(%arg0: i32, %arg1: i32) -> (i32, i32, i32) {
    %c0_i32 = arith.constant 0 : i32
    %c0_i32_0 = arith.constant 0 : i32
    %c0_i32_1 = arith.constant 0 : i32
    %c0_i32_2 = arith.constant 0 : i32
    return %c0_i32, %c0_i32_0, %c0_i32_1 : i32, i32, i32
  }
  func.func @transform_15(%arg0: i32, %arg1: i32) -> (i32, i32, i32) {
    %c0_i32 = arith.constant 0 : i32
    %c0_i32_0 = arith.constant 0 : i32
    %c0_i32_1 = arith.constant 0 : i32
    %c0_i32_2 = arith.constant 0 : i32
    return %c0_i32, %c0_i32_0, %c0_i32_1 : i32, i32, i32
  }
  func.func @transform_16(%arg0: i32, %arg1: i32) -> (i32, i32) {
    %c0_i32 = arith.constant 0 : i32
    %c0_i32_0 = arith.constant 0 : i32
    %c0_i32_1 = arith.constant 0 : i32
    return %c0_i32, %c0_i32_0 : i32, i32
  }
  func.func @transform_17(%arg0: i32, %arg1: i32) -> (i32, i32, i32) {
    %c0_i32 = arith.constant 0 : i32
    %c0_i32_0 = arith.constant 0 : i32
    return %arg0, %arg1, %c0_i32 : i32, i32, i32
  }
}

</mosaic_0001>

<bundles_post_ra>
// kernel: tpu_custom_call.1
= control target key start
LH: loop header
LB: loop body
LE: loop exit
PB: predicated region body
PF: predicated region fallthrough
CT: control target
= control target key end

     0   :  { %s5326_s0 = inlined_call_operand.hbm [shape: f32[2,8,32], index: 0, kind: input, shape index: {}]   ;;  %s5327_s1 = inlined_call_operand.hbm [shape: f32[1,32], index: 1, kind: input, shape index: {}]   ;;  %s5328_s2 = inlined_call_operand.hbm [shape: f32[1,32], index: 2, kind: input, shape index: {}]   ;;  %s5329_s3 = inlined_call_operand.hbm [shape: f32[32,32], index: 3, kind: input, shape index: {}]   ;;  %s5330_s4 = inlined_call_operand.hbm [shape: f32[1,32], index: 4, kind: input, shape index: {}]   ;;  %s5331_s5 = inlined_call_operand.hbm [shape: f32[32,32], index: 5, kind: input, shape index: {}]   ;;  %s5332_s6 = inlined_call_operand.hbm [shape: f32[1,32], index: 6, kind: input, shape index: {}]   ;;  %s5333_s7 = inlined_call_operand.hbm [shape: f32[32,32], index: 7, kind: input, shape index: {}]   ;;  %s5334_s8 = inlined_call_operand.hbm [shape: f32[1,32], index: 8, kind: input, shape index: {}]   ;;  %s5335_s9 = inlined_call_operand.hbm [shape: f32[32,32], index: 9, kind: input, shape index: {}]   ;;  %s5336_s10 = inlined_call_operand.hbm [shape: f32[1,32], index: 10, kind: input, shape index: {}]   ;;  %s5337_s11 = inlined_call_operand.hbm [shape: f32[1,32], index: 11, kind: input, shape index: {}]   ;;  %s5338_s12 = inlined_call_operand.hbm [shape: f32[1,32], index: 12, kind: input, shape index: {}]   ;;  %s5339_s13 = inlined_call_operand.hbm [shape: f32[1,32,128], index: 13, kind: input, shape index: {}]   ;;  %s5340_s14 = inlined_call_operand.hbm [shape: f32[1,1,128], index: 14, kind: input, shape index: {}]   ;;  %s5341_s15 = inlined_call_operand.hbm [shape: f32[1,128,32], index: 15, kind: input, shape index: {}]   ;;  %s5342_s16 = inlined_call_operand.hbm [shape: f32[1,32], index: 16, kind: input, shape index: {}]   ;;  %s5343_s17 = inlined_call_operand.hbm [shape: f32[2,8,32], index: 17, kind: output, shape index: {}]  }
   0x1   :  { %5362 = sst [smem:[#allocation55_spill]] %s5326_s0 }
   0x2   :  { %5363 = sst [smem:[#allocation56_spill]] %s5327_s1 }
   0x3   :  { %5364 = sst [smem:[#allocation57_spill]] %s5328_s2 }
   0x4   :  { %5365 = sst [smem:[#allocation58_spill]] %s5329_s3 }
   0x5   :  { %5366 = sst [smem:[#allocation59_spill]] %s5330_s4 }
   0x6   :  { %5367 = sst [smem:[#allocation60_spill]] %s5331_s5 }
   0x7   :  { %5368 = sst [smem:[#allocation61_spill]] %s5343_s17 }
   0x8   :  { %22 = vsyncpa [#allocation10], 0 }
   0x9   :  { %24 = vsyncpa [#allocation10 + $0x1], 0 }
   0xa   :  { %25 = vsyncpa [#allocation13], 0 }
   0xb   :  { %26 = vsyncpa [#allocation16], 0 }
   0xc   :  { %27 = vsyncpa [#allocation19], 0 }
   0xd   :  { %28 = vsyncpa [#allocation22], 0 }
   0xe   :  { %29 = vsyncpa [#allocation25], 0 }
   0xf   :  { %30 = vsyncpa [#allocation28], 0 }
  0x10   :  { %31 = vsyncpa [#allocation31], 0 }
  0x11   :  { %32 = vsyncpa [#allocation34], 0 }
  0x12   :  { %33 = vsyncpa [#allocation11], 0 }
  0x13   :  { %35 = vsyncpa [#allocation11 + $0x1], 0  ;;  %s4591_s24 = smov 0   ;;  %s4593_s25 = smov 0  }
  0x14   :  { %s4595_s26 = smov 0   ;;  %s4597_s27 = smov 0  }
  0x15   :  { %s4599_s28 = smov 0   ;;  %s4601_s29 = smov 0  }
  0x16 LB: > { %5369 = sst [smem:[#allocation47_spill]] %s4448_s24  ;;  %s5346_s0 = sadd.s32 4294967295, %s4468_s29   ;;  %s4468_s29 = sphi %s4601_s29, %s41_s29   ;;  %s4464_s28 = sphi %s4599_s28, %s5418_s28   ;;  %s4460_s27 = sphi %s4597_s27, %s5417_s27   ;;  %s4456_s26 = sphi %s4595_s26, %s5416_s26   ;;  %s4452_s25 = sphi %s4593_s25, %s5414_s25   ;;  %s4448_s24 = sphi %s4591_s24, %s5413_s24  }
  0x17   : > { %5370 = sst [smem:[#allocation48_spill]] %s4452_s25  ;;  %p3277_p0 = scmp.ge.s32.totalorder %s4468_s29, 1 }
  0x18   : > { %5371 = sst [smem:[#allocation49_spill]] %s4456_s26  ;;  %p4625_p1 = scmp.eq.s32.totalorder %s5346_s0, 0 }
  0x19   : > { %5372 = sst [smem:[#allocation50_spill]] %s4460_s27  ;;  %p450_p2 = scmp.lt.s32.totalorder %s4468_s29, 3 }
  0x1a   : > { %5373 = sst [smem:[#allocation51_spill]] %s4464_s28  ;;  %s4470_s19 = smov [#allocation12]  }
  0x1b   : > { %5374 = sst [smem:[#allocation52_spill]] %s4468_s29  ;;  %p4630_p3 = pnand %p3277_p0, %p450_p2 }
  0x1c   : > { %s5375_s30 = scalar_select %p4625_p1, 1, 0 }
  0x1d   : > { %s5377_s18 = scalar_select %p4630_p3, 1, 0 }
  0x1e   : > { %5376 = sst [smem:[#allocation53_spill]] %s5375_s30  ;;  %s463_s1 = sshll.u32 %s4470_s19, 4  ;;  %s464_s1 = int_to_ptr.vmem [resolvable:$true] %s463_s1 }
  0x1f   : > { %5378 = sst [smem:[#allocation54_spill]] %s5377_s18  ;;  %p3676_p5 = pneg %p4630_p3 }
  0x20   : > { %s4471_s20 = smov [#allocation15]   ;;  %s4472_s23 = smov [#allocation18]  }
  0x21   : > { %s484_s21 = sshll.u32 %s4471_s20, 4  ;;  %p4639_p6 = pnand %p3676_p5, %p4625_p1  ;;  %s4643_s21 = int_to_ptr.vmem [resolvable:$true] %s484_s21 }
  0x22   : > { %s4645_s0 = sshll.u32 %s4472_s23, 4  ;;  %s5380_s19 = sld [smem:[#allocation56_spill]]  ;;  %s509_s0 = int_to_ptr.vmem [resolvable:$true] %s4645_s0 }
  0x23   : > { %p4655_p8 = pneg %p4639_p6 }
  0x28   : > { %s3876_s24 = scalar_lea.hbm %s5380_s19, 16 }
  0x29   : > { %p3877_p7 = scmp.ne.s32.totalorder %s5380_s19, %s3876_s24  ;;  %p3883_p11 = scmp.lt.u32.totalorder %s3876_s24, %s5380_s19 }
  0x2b   : > { %p3879_p9 = pnand %p4655_p8, %p3877_p7 }
  0x2d   : > { %p3880_p10 = pneg %p3879_p9 }
  0x2f   : > { %p3885_p12 = pnand %p3883_p11, %p3880_p10 }
  0x31   : > { %3888 = shalt.err (!%p3885_p12)
}
  0x32   : > { %s3889_s17 = scalar_lea.vmem %s464_s1, 16  ;;  %s3896_s25 = scalar_lea.vmem %s464_s1, 32 }
  0x33   : > { %p3890_p13 = scmp.ne.s32.totalorder %s464_s1, %s3889_s17  ;;  %p3897_p5 = scmp.lt.s32.totalorder %s464_s1, %s464_s1 }
  0x34   : > { %p3898_p4 = scmp.lt.s32.totalorder %s3896_s25, %s3889_s17 }
  0x35   : > { %p3892_p0 = pnand %p3890_p13, %p4655_p8 }
  0x36   : > { %p3899_p3 = por %p3898_p4, %p3897_p5 }
  0x37   : > { %p3893_p2 = pneg %p3892_p0 }
  0x39   : > { %p3900_p1 = pnand %p3899_p3, %p3893_p2 }
  0x3b   : > { %3903 = shalt.err (!%p3900_p1)
}
  0x3c   : > { %3679 = dma.hbm_to_vmem [thread:$0]  (!%p4639_p6), %s5380_s19, 16, %s464_s1, [#allocation13]  }
  0x3d   : > { %s5382_s3 = sld [smem:[#allocation58_spill]] }
  0x43   : > { %s3904_s23 = scalar_lea.hbm %s5382_s3, 512 }
  0x44   : > { %p3905_p7 = scmp.ne.s32.totalorder %s5382_s3, %s3904_s23  ;;  %p3911_p1 = scmp.lt.u32.totalorder %s3904_s23, %s5382_s3 }
  0x46   : > { %p3907_p9 = pnand %p3905_p7, %p4655_p8 }
  0x48   : > { %p3908_p4 = pneg %p3907_p9 }
  0x4a   : > { %p3913_p3 = pnand %p3911_p1, %p3908_p4 }
  0x4c   : > { %3916 = shalt.err (!%p3913_p3)
}
  0x4d   : > { %s3917_s1 = scalar_lea.vmem %s4643_s21, 512  ;;  %p3925_p13 = scmp.lt.s32.totalorder %s4643_s21, %s4643_s21 }
  0x4e   : > { %p3918_p10 = scmp.ne.s32.totalorder %s4643_s21, %s3917_s1  ;;  %p3926_p0 = scmp.lt.s32.totalorder %s3917_s1, %s3917_s1 }
  0x50   : > { %p3920_p11 = pnand %p3918_p10, %p4655_p8  ;;  %p3927_p2 = por %p3926_p0, %p3925_p13 }
  0x52   : > { %p3921_p12 = pneg %p3920_p11 }
  0x54   : > { %p3928_p5 = pnand %p3927_p2, %p3921_p12 }
  0x56   : > { %3931 = shalt.err (!%p3928_p5)
}
  0x57   : > { %s4473_s26 = smov 128   ;;  %s4474_s28 = smov 8  }
  0x58   : > { %3685 = dma.hbm_to_vmem [thread:$0]  (!%p4639_p6), %s5382_s3, 512, %s4643_s21, [#allocation16], %s4473_s26, %s4473_s26, %s4474_s28  }
  0x59   : > { %s5383_s5 = sld [smem:[#allocation60_spill]] }
  0x5f   : > { %s3932_s23 = scalar_lea.hbm %s5383_s5, 512 }
  0x60   : > { %p3933_p7 = scmp.ne.s32.totalorder %s5383_s5, %s3932_s23  ;;  %p3939_p1 = scmp.lt.u32.totalorder %s3932_s23, %s5383_s5 }
  0x62   : > { %p3935_p9 = pnand %p3933_p7, %p4655_p8 }
  0x64   : > { %p3936_p4 = pneg %p3935_p9 }
  0x66   : > { %p3941_p3 = pnand %p3939_p1, %p3936_p4 }
  0x68   : > { %3944 = shalt.err (!%p3941_p3)
}
  0x69   : > { %s3945_s27 = scalar_lea.vmem %s509_s0, 512  ;;  %p3953_p13 = scmp.lt.s32.totalorder %s509_s0, %s509_s0 }
  0x6a   : > { %p3946_p10 = scmp.ne.s32.totalorder %s509_s0, %s3945_s27  ;;  %p3954_p0 = scmp.lt.s32.totalorder %s3945_s27, %s3945_s27 }
  0x6c   : > { %p3948_p11 = pnand %p3946_p10, %p4655_p8  ;;  %p3955_p2 = por %p3954_p0, %p3953_p13 }
  0x6e   : > { %p3949_p12 = pneg %p3948_p11 }
  0x70   : > { %p3956_p5 = pnand %p3955_p2, %p3949_p12 }
  0x72   : > { %3959 = shalt.err (!%p3956_p5)
}
  0x73   : > { %3691 = dma.hbm_to_vmem [thread:$0]  (!%p4639_p6), %s5383_s5, 512, %s509_s0, [#allocation19], %s4473_s26, %s4473_s26, %s4474_s28  }
  0x74   : > { %s4475_s18 = smov [#allocation21]   ;;  %s4476_s30 = smov [#allocation24]  }
  0x75   : > { %s532_s24 = sshll.u32 %s4475_s18, 4  ;;  %s556_s23 = sshll.u32 %s4476_s30, 4  ;;  %s533_s24 = int_to_ptr.vmem [resolvable:$true] %s532_s24  ;;  %s557_s23 = int_to_ptr.vmem [resolvable:$true] %s556_s23 }
  0x76   : > { %s3960_s1 = scalar_lea.hbm %s5333_s7, 512 }
  0x77   : > { %p3961_p7 = scmp.ne.s32.totalorder %s5333_s7, %s3960_s1  ;;  %p3967_p1 = scmp.lt.u32.totalorder %s3960_s1, %s5333_s7 }
  0x79   : > { %p3963_p9 = pnand %p3961_p7, %p4655_p8 }
  0x7b   : > { %p3964_p4 = pneg %p3963_p9 }
  0x7d   : > { %p3969_p3 = pnand %p3967_p1, %p3964_p4 }
  0x7f   : > { %3972 = shalt.err (!%p3969_p3)
}
  0x80   : > { %s3973_s0 = scalar_lea.vmem %s533_s24, 512  ;;  %p3981_p13 = scmp.lt.s32.totalorder %s533_s24, %s533_s24 }
  0x81   : > { %p3974_p10 = scmp.ne.s32.totalorder %s533_s24, %s3973_s0  ;;  %p3982_p0 = scmp.lt.s32.totalorder %s3973_s0, %s3973_s0 }
  0x83   : > { %p3976_p11 = pnand %p3974_p10, %p4655_p8  ;;  %p3983_p2 = por %p3982_p0, %p3981_p13 }
  0x85   : > { %p3977_p12 = pneg %p3976_p11 }
  0x87   : > { %p3984_p5 = pnand %p3983_p2, %p3977_p12 }
  0x89   : > { %3987 = shalt.err (!%p3984_p5)
}
  0x8a   : > { %3697 = dma.hbm_to_vmem [thread:$0]  (!%p4639_p6), %s5333_s7, 512, %s533_s24, [#allocation22], %s4473_s26, %s4473_s26, %s4474_s28  }
  0x8b   : > { %s3988_s30 = scalar_lea.hbm %s5335_s9, 512 }
  0x8c   : > { %p3989_p7 = scmp.ne.s32.totalorder %s5335_s9, %s3988_s30  ;;  %p3995_p1 = scmp.lt.u32.totalorder %s3988_s30, %s5335_s9 }
  0x8e   : > { %p3991_p9 = pnand %p3989_p7, %p4655_p8 }
  0x90   : > { %p3992_p4 = pneg %p3991_p9 }
  0x92   : > { %p3997_p3 = pnand %p3995_p1, %p3992_p4 }
  0x94   : > { %4000 = shalt.err (!%p3997_p3)
}
  0x95   : > { %s4001_s21 = scalar_lea.vmem %s557_s23, 512  ;;  %p4009_p13 = scmp.lt.s32.totalorder %s557_s23, %s557_s23 }
  0x96   : > { %p4002_p10 = scmp.ne.s32.totalorder %s557_s23, %s4001_s21  ;;  %p4010_p0 = scmp.lt.s32.totalorder %s4001_s21, %s4001_s21 }
  0x98   : > { %p4004_p11 = pnand %p4002_p10, %p4655_p8  ;;  %p4011_p2 = por %p4010_p0, %p4009_p13 }
  0x9a   : > { %p4005_p12 = pneg %p4004_p11 }
  0x9c   : > { %p4012_p5 = pnand %p4011_p2, %p4005_p12 }
  0x9e   : > { %4015 = shalt.err (!%p4012_p5)
}
  0x9f   : > { %3703 = dma.hbm_to_vmem [thread:$0]  (!%p4639_p6), %s5335_s9, 512, %s557_s23, [#allocation25], %s4473_s26, %s4473_s26, %s4474_s28  }
  0xa0   : > { %s4477_s3 = smov [#allocation27]   ;;  %s4478_s19 = smov [#allocation30]  }
  0xa1   : > { %s581_s29 = sshll.u32 %s4477_s3, 4  ;;  %s602_s18 = sshll.u32 %s4478_s19, 4  ;;  %s582_s29 = int_to_ptr.vmem [resolvable:$true] %s581_s29  ;;  %s603_s18 = int_to_ptr.vmem [resolvable:$true] %s602_s18 }
  0xa2   : > { %s4016_s25 = scalar_lea.hbm %s5337_s11, 16 }
  0xa3   : > { %p4017_p7 = scmp.ne.s32.totalorder %s5337_s11, %s4016_s25  ;;  %p4023_p1 = scmp.lt.u32.totalorder %s4016_s25, %s5337_s11 }
  0xa5   : > { %p4019_p9 = pnand %p4017_p7, %p4655_p8 }
  0xa7   : > { %p4020_p4 = pneg %p4019_p9 }
  0xa9   : > { %p4025_p3 = pnand %p4023_p1, %p4020_p4 }
  0xab   : > { %4028 = shalt.err (!%p4025_p3)
}
  0xac   : > { %s4029_s23 = scalar_lea.vmem %s582_s29, 16  ;;  %s4036_s0 = scalar_lea.vmem %s582_s29, 32 }
  0xad   : > { %p4030_p10 = scmp.ne.s32.totalorder %s582_s29, %s4029_s23  ;;  %p4037_p13 = scmp.lt.s32.totalorder %s582_s29, %s582_s29 }
  0xae   : > { %p4038_p0 = scmp.lt.s32.totalorder %s4036_s0, %s4029_s23 }
  0xaf   : > { %p4032_p11 = pnand %p4030_p10, %p4655_p8 }
  0xb0   : > { %p4039_p2 = por %p4038_p0, %p4037_p13 }
  0xb1   : > { %p4033_p12 = pneg %p4032_p11 }
  0xb3   : > { %p4040_p5 = pnand %p4039_p2, %p4033_p12 }
  0xb5   : > { %4043 = shalt.err (!%p4040_p5)
}
  0xb6   : > { %3709 = dma.hbm_to_vmem [thread:$0]  (!%p4639_p6), %s5337_s11, 16, %s582_s29, [#allocation28]  }
  0xb7   : > { %s4044_s25 = scalar_lea.hbm %s5339_s13, 512 }
  0xb8   : > { %p4045_p7 = scmp.ne.s32.totalorder %s5339_s13, %s4044_s25  ;;  %p4051_p1 = scmp.lt.u32.totalorder %s4044_s25, %s5339_s13 }
  0xba   : > { %p4047_p9 = pnand %p4045_p7, %p4655_p8 }
  0xbc   : > { %p4048_p4 = pneg %p4047_p9 }
  0xbe   : > { %p4053_p3 = pnand %p4051_p1, %p4048_p4 }
  0xc0   : > { %4056 = shalt.err (!%p4053_p3)
}
  0xc1   : > { %s4057_s23 = scalar_lea.vmem %s603_s18, 512  ;;  %p4065_p13 = scmp.lt.s32.totalorder %s603_s18, %s603_s18 }
  0xc2   : > { %p4058_p10 = scmp.ne.s32.totalorder %s603_s18, %s4057_s23  ;;  %p4066_p0 = scmp.lt.s32.totalorder %s4057_s23, %s4057_s23 }
  0xc4   : > { %p4060_p11 = pnand %p4058_p10, %p4655_p8  ;;  %p4067_p2 = por %p4066_p0, %p4065_p13 }
  0xc6   : > { %p4061_p12 = pneg %p4060_p11 }
  0xc8   : > { %p4068_p5 = pnand %p4067_p2, %p4061_p12 }
  0xca   : > { %4071 = shalt.err (!%p4068_p5)
}
  0xcb   : > { %3715 = dma.hbm_to_vmem [thread:$0]  (!%p4639_p6), %s5339_s13, 512, %s603_s18, [#allocation31], %s4473_s26, %s4473_s26, %s4474_s28  }
  0xcc   : > { %s4479_s3 = smov [#allocation33]   ;;  %s4480_s30 = smov [#allocation14]  }
  0xcd   : > { %s626_s19 = sshll.u32 %s4479_s3, 4  ;;  %s474_s17 = sshll.u32 %s4480_s30, 4  ;;  %s627_s19 = int_to_ptr.vmem [resolvable:$true] %s626_s19  ;;  %s475_s17 = int_to_ptr.vmem [resolvable:$true] %s474_s17 }
  0xce   : > { %s4072_s27 = scalar_lea.hbm %s5341_s15, 2048 }
  0xcf   : > { %p4073_p7 = scmp.ne.s32.totalorder %s5341_s15, %s4072_s27  ;;  %p4079_p1 = scmp.lt.u32.totalorder %s4072_s27, %s5341_s15 }
  0xd1   : > { %p4075_p9 = pnand %p4073_p7, %p4655_p8 }
  0xd3   : > { %p4076_p4 = pneg %p4075_p9 }
  0xd5   : > { %p4081_p3 = pnand %p4079_p1, %p4076_p4 }
  0xd7   : > { %4084 = shalt.err (!%p4081_p3)
}
  0xd8   : > { %s4085_s18 = scalar_lea.vmem %s627_s19, 2048  ;;  %p4093_p13 = scmp.lt.s32.totalorder %s627_s19, %s627_s19 }
  0xd9   : > { %p4086_p10 = scmp.ne.s32.totalorder %s627_s19, %s4085_s18  ;;  %p4094_p0 = scmp.lt.s32.totalorder %s4085_s18, %s4085_s18 }
  0xdb   : > { %p4088_p11 = pnand %p4086_p10, %p4655_p8  ;;  %p4095_p2 = por %p4094_p0, %p4093_p13 }
  0xdd   : > { %p4089_p12 = pneg %p4088_p11 }
  0xdf   : > { %p4096_p5 = pnand %p4095_p2, %p4089_p12 }
  0xe1   : > { %4099 = shalt.err (!%p4096_p5)
}
  0xe2   : > { %3721 = dma.hbm_to_vmem [thread:$0]  (!%p4639_p6), %s5341_s15, 2048, %s627_s19, [#allocation34], %s4473_s26, %s4473_s26, %s4474_s28  }
  0xe3   : > { %s5384_s2 = sld [smem:[#allocation57_spill]] }
  0xe9   : > { %s4100_s1 = scalar_lea.hbm %s5384_s2, 16 }
  0xea   : > { %p4101_p7 = scmp.ne.s32.totalorder %s5384_s2, %s4100_s1  ;;  %p4107_p1 = scmp.lt.u32.totalorder %s4100_s1, %s5384_s2 }
  0xec   : > { %p4103_p9 = pnand %p4101_p7, %p4655_p8 }
  0xee   : > { %p4104_p4 = pneg %p4103_p9 }
  0xf0   : > { %p4109_p3 = pnand %p4107_p1, %p4104_p4 }
  0xf2   : > { %4112 = shalt.err (!%p4109_p3)
}
  0xf3   : > { %s4113_s29 = scalar_lea.vmem %s475_s17, 16  ;;  %s4120_s26 = scalar_lea.vmem %s475_s17, 32 }
  0xf4   : > { %p4114_p10 = scmp.ne.s32.totalorder %s475_s17, %s4113_s29  ;;  %p4121_p13 = scmp.lt.s32.totalorder %s475_s17, %s475_s17 }
  0xf5   : > { %p4122_p0 = scmp.lt.s32.totalorder %s4120_s26, %s4113_s29 }
  0xf6   : > { %p4116_p11 = pnand %p4114_p10, %p4655_p8 }
  0xf7   : > { %p4123_p2 = por %p4122_p0, %p4121_p13 }
  0xf8   : > { %p4117_p12 = pneg %p4116_p11 }
  0xfa   : > { %p4124_p5 = pnand %p4123_p2, %p4117_p12 }
  0xfc   : > { %4127 = shalt.err (!%p4124_p5)
}
  0xfd   : > { %3682 = dma.hbm_to_vmem [thread:$0]  (!%p4639_p6), %s5384_s2, 16, %s475_s17, [#allocation13]  }
  0xfe   : > { %s4481_s18 = smov [#allocation17]   ;;  %s4482_s3 = smov [#allocation20]  }
  0xff   : > { %s498_s0 = sshll.u32 %s4481_s18, 4  ;;  %s522_s30 = sshll.u32 %s4482_s3, 4  ;;  %s499_s0 = int_to_ptr.vmem [resolvable:$true] %s498_s0  ;;  %s523_s30 = int_to_ptr.vmem [resolvable:$true] %s522_s30 }
 0x100   : > { %s5385_s4 = sld [smem:[#allocation59_spill]] }
 0x106   : > { %s4128_s27 = scalar_lea.hbm %s5385_s4, 16 }
 0x107   : > { %p4129_p7 = scmp.ne.s32.totalorder %s5385_s4, %s4128_s27  ;;  %p4135_p1 = scmp.lt.u32.totalorder %s4128_s27, %s5385_s4 }
 0x109   : > { %p4131_p9 = pnand %p4129_p7, %p4655_p8 }
 0x10b   : > { %p4132_p4 = pneg %p4131_p9 }
 0x10d   : > { %p4137_p3 = pnand %p4135_p1, %p4132_p4 }
 0x10f   : > { %4140 = shalt.err (!%p4137_p3)
}
 0x110   : > { %s4141_s17 = scalar_lea.vmem %s499_s0, 16  ;;  %s4148_s26 = scalar_lea.vmem %s499_s0, 32 }
 0x111   : > { %p4142_p10 = scmp.ne.s32.totalorder %s499_s0, %s4141_s17  ;;  %p4149_p13 = scmp.lt.s32.totalorder %s499_s0, %s499_s0 }
 0x112   : > { %p4150_p0 = scmp.lt.s32.totalorder %s4148_s26, %s4141_s17 }
 0x113   : > { %p4144_p11 = pnand %p4142_p10, %p4655_p8 }
 0x114   : > { %p4151_p2 = por %p4150_p0, %p4149_p13 }
 0x115   : > { %p4145_p12 = pneg %p4144_p11 }
 0x117   : > { %p4152_p5 = pnand %p4151_p2, %p4145_p12 }
 0x119   : > { %4155 = shalt.err (!%p4152_p5)
}
 0x11a   : > { %3688 = dma.hbm_to_vmem [thread:$0]  (!%p4639_p6), %s5385_s4, 16, %s499_s0, [#allocation16]  }
 0x11b   : > { %s4156_s25 = scalar_lea.hbm %s5332_s6, 16 }
 0x11c   : > { %p4157_p7 = scmp.ne.s32.totalorder %s5332_s6, %s4156_s25  ;;  %p4163_p1 = scmp.lt.u32.totalorder %s4156_s25, %s5332_s6 }
 0x11e   : > { %p4159_p9 = pnand %p4157_p7, %p4655_p8 }
 0x120   : > { %p4160_p4 = pneg %p4159_p9 }
 0x122   : > { %p4165_p3 = pnand %p4163_p1, %p4160_p4 }
 0x124   : > { %4168 = shalt.err (!%p4165_p3)
}
 0x125   : > { %s4169_s23 = scalar_lea.vmem %s523_s30, 16  ;;  %s4176_s0 = scalar_lea.vmem %s523_s30, 32 }
 0x126   : > { %p4170_p10 = scmp.ne.s32.totalorder %s523_s30, %s4169_s23  ;;  %p4177_p13 = scmp.lt.s32.totalorder %s523_s30, %s523_s30 }
 0x127   : > { %p4178_p0 = scmp.lt.s32.totalorder %s4176_s0, %s4169_s23 }
 0x128   : > { %p4172_p11 = pnand %p4170_p10, %p4655_p8 }
 0x129   : > { %p4179_p2 = por %p4178_p0, %p4177_p13 }
 0x12a   : > { %p4173_p12 = pneg %p4172_p11 }
 0x12c   : > { %p4180_p5 = pnand %p4179_p2, %p4173_p12 }
 0x12e   : > { %4183 = shalt.err (!%p4180_p5)
}
 0x12f   : > { %3694 = dma.hbm_to_vmem [thread:$0]  (!%p4639_p6), %s5332_s6, 16, %s523_s30, [#allocation19]  }
 0x130   : > { %s4483_s26 = smov [#allocation23]   ;;  %s4484_s19 = smov [#allocation26]  }
 0x131   : > { %s546_s28 = sshll.u32 %s4483_s26, 4  ;;  %s570_s18 = sshll.u32 %s4484_s19, 4  ;;  %s547_s28 = int_to_ptr.vmem [resolvable:$true] %s546_s28  ;;  %s571_s18 = int_to_ptr.vmem [resolvable:$true] %s570_s18 }
 0x132   : > { %s4184_s1 = scalar_lea.hbm %s5334_s8, 16 }
 0x133   : > { %p4185_p7 = scmp.ne.s32.totalorder %s5334_s8, %s4184_s1  ;;  %p4191_p1 = scmp.lt.u32.totalorder %s4184_s1, %s5334_s8 }
 0x135   : > { %p4187_p9 = pnand %p4185_p7, %p4655_p8 }
 0x137   : > { %p4188_p4 = pneg %p4187_p9 }
 0x139   : > { %p4193_p3 = pnand %p4191_p1, %p4188_p4 }
 0x13b   : > { %4196 = shalt.err (!%p4193_p3)
}
 0x13c   : > { %s4197_s30 = scalar_lea.vmem %s547_s28, 16  ;;  %s4204_s0 = scalar_lea.vmem %s547_s28, 32 }
 0x13d   : > { %p4198_p10 = scmp.ne.s32.totalorder %s547_s28, %s4197_s30  ;;  %p4205_p13 = scmp.lt.s32.totalorder %s547_s28, %s547_s28 }
 0x13e   : > { %p4206_p0 = scmp.lt.s32.totalorder %s4204_s0, %s4197_s30 }
 0x13f   : > { %p4200_p11 = pnand %p4198_p10, %p4655_p8 }
 0x140   : > { %p4207_p2 = por %p4206_p0, %p4205_p13 }
 0x141   : > { %p4201_p12 = pneg %p4200_p11 }
 0x143   : > { %p4208_p5 = pnand %p4207_p2, %p4201_p12 }
 0x145   : > { %4211 = shalt.err (!%p4208_p5)
}
 0x146   : > { %3700 = dma.hbm_to_vmem [thread:$0]  (!%p4639_p6), %s5334_s8, 16, %s547_s28, [#allocation22]  }
 0x147   : > { %s4212_s3 = scalar_lea.hbm %s5336_s10, 16 }
 0x148   : > { %p4213_p7 = scmp.ne.s32.totalorder %s5336_s10, %s4212_s3  ;;  %p4219_p1 = scmp.lt.u32.totalorder %s4212_s3, %s5336_s10 }
 0x14a   : > { %p4215_p9 = pnand %p4213_p7, %p4655_p8 }
 0x14c   : > { %p4216_p4 = pneg %p4215_p9 }
 0x14e   : > { %p4221_p3 = pnand %p4219_p1, %p4216_p4 }
 0x150   : > { %4224 = shalt.err (!%p4221_p3)
}
 0x151   : > { %s4225_s24 = scalar_lea.vmem %s571_s18, 16  ;;  %s4232_s28 = scalar_lea.vmem %s571_s18, 32 }
 0x152   : > { %p4226_p10 = scmp.ne.s32.totalorder %s571_s18, %s4225_s24  ;;  %p4233_p13 = scmp.lt.s32.totalorder %s571_s18, %s571_s18 }
 0x153   : > { %p4234_p0 = scmp.lt.s32.totalorder %s4232_s28, %s4225_s24 }
 0x154   : > { %p4228_p11 = pnand %p4226_p10, %p4655_p8 }
 0x155   : > { %p4235_p2 = por %p4234_p0, %p4233_p13 }
 0x156   : > { %p4229_p12 = pneg %p4228_p11 }
 0x158   : > { %p4236_p5 = pnand %p4235_p2, %p4229_p12 }
 0x15a   : > { %4239 = shalt.err (!%p4236_p5)
}
 0x15b   : > { %3706 = dma.hbm_to_vmem [thread:$0]  (!%p4639_p6), %s5336_s10, 16, %s571_s18, [#allocation25]  }
 0x15c   : > { %s4485_s0 = smov [#allocation29]   ;;  %s4486_s17 = smov [#allocation32]  }
 0x15d   : > { %s592_s29 = sshll.u32 %s4485_s0, 4  ;;  %s616_s26 = sshll.u32 %s4486_s17, 4  ;;  %s593_s29 = int_to_ptr.vmem [resolvable:$true] %s592_s29  ;;  %s617_s26 = int_to_ptr.vmem [resolvable:$true] %s616_s26 }
 0x15e   : > { %s4240_s25 = scalar_lea.hbm %s5338_s12, 16 }
 0x15f   : > { %p4241_p7 = scmp.ne.s32.totalorder %s5338_s12, %s4240_s25  ;;  %p4247_p1 = scmp.lt.u32.totalorder %s4240_s25, %s5338_s12 }
 0x161   : > { %p4243_p9 = pnand %p4241_p7, %p4655_p8 }
 0x163   : > { %p4244_p4 = pneg %p4243_p9 }
 0x165   : > { %p4249_p3 = pnand %p4247_p1, %p4244_p4 }
 0x167   : > { %4252 = shalt.err (!%p4249_p3)
}
 0x168   : > { %s4253_s18 = scalar_lea.vmem %s593_s29, 16  ;;  %s4260_s28 = scalar_lea.vmem %s593_s29, 32 }
 0x169   : > { %p4254_p10 = scmp.ne.s32.totalorder %s593_s29, %s4253_s18  ;;  %p4261_p13 = scmp.lt.s32.totalorder %s593_s29, %s593_s29 }
 0x16a   : > { %p4262_p0 = scmp.lt.s32.totalorder %s4260_s28, %s4253_s18 }
 0x16b   : > { %p4256_p11 = pnand %p4254_p10, %p4655_p8 }
 0x16c   : > { %p4263_p2 = por %p4262_p0, %p4261_p13 }
 0x16d   : > { %p4257_p12 = pneg %p4256_p11 }
 0x16f   : > { %p4264_p5 = pnand %p4263_p2, %p4257_p12 }
 0x171   : > { %4267 = shalt.err (!%p4264_p5)
}
 0x172   : > { %3712 = dma.hbm_to_vmem [thread:$0]  (!%p4639_p6), %s5338_s12, 16, %s593_s29, [#allocation28]  }
 0x173   : > { %s4268_s19 = scalar_lea.hbm %s5340_s14, 16 }
 0x174   : > { %p4269_p7 = scmp.ne.s32.totalorder %s5340_s14, %s4268_s19  ;;  %p4275_p1 = scmp.lt.u32.totalorder %s4268_s19, %s5340_s14 }
 0x176   : > { %p4271_p9 = pnand %p4269_p7, %p4655_p8 }
 0x178   : > { %p4272_p4 = pneg %p4271_p9 }
 0x17a   : > { %p4277_p3 = pnand %p4275_p1, %p4272_p4 }
 0x17c   : > { %4280 = shalt.err (!%p4277_p3)
}
 0x17d   : > { %s4281_s21 = scalar_lea.vmem %s617_s26, 16  ;;  %s4288_s29 = scalar_lea.vmem %s617_s26, 32 }
 0x17e   : > { %p4282_p10 = scmp.ne.s32.totalorder %s617_s26, %s4281_s21  ;;  %p4289_p13 = scmp.lt.s32.totalorder %s617_s26, %s617_s26 }
 0x17f   : > { %p4290_p0 = scmp.lt.s32.totalorder %s4288_s29, %s4281_s21 }
 0x180   : > { %p4284_p11 = pnand %p4282_p10, %p4655_p8 }
 0x181   : > { %p4291_p2 = por %p4290_p0, %p4289_p13 }
 0x182   : > { %p4285_p12 = pneg %p4284_p11 }
 0x184   : > { %p4292_p5 = pnand %p4291_p2, %p4285_p12 }
 0x186   : > { %4295 = shalt.err (!%p4292_p5)
}
 0x187   : > { %3718 = dma.hbm_to_vmem [thread:$0]  (!%p4639_p6), %s5340_s14, 16, %s617_s26, [#allocation31]  }
 0x188   : > { %s4487_s28 = smov [#allocation35]   ;;  %s4296_s17 = scalar_lea.hbm %s5342_s16, 16 }
 0x189   : > { %s640_s23 = sshll.u32 %s4487_s28, 4  ;;  %p4297_p7 = scmp.ne.s32.totalorder %s5342_s16, %s4296_s17  ;;  %s641_s23 = int_to_ptr.vmem [resolvable:$true] %s640_s23 }
 0x18a   : > { %p4303_p1 = scmp.lt.u32.totalorder %s4296_s17, %s5342_s16 }
 0x18b   : > { %p4299_p9 = pnand %p4297_p7, %p4655_p8 }
 0x18d   : > { %p4300_p4 = pneg %p4299_p9 }
 0x18f   : > { %p4305_p3 = pnand %p4303_p1, %p4300_p4 }
 0x191   : > { %4308 = shalt.err (!%p4305_p3)
}
 0x192   : > { %s4309_s26 = scalar_lea.vmem %s641_s23, 16  ;;  %s4316_s27 = scalar_lea.vmem %s641_s23, 32 }
 0x193   : > { %p4310_p10 = scmp.ne.s32.totalorder %s641_s23, %s4309_s26  ;;  %p4317_p13 = scmp.lt.s32.totalorder %s641_s23, %s641_s23 }
 0x194   : > { %p4318_p0 = scmp.lt.s32.totalorder %s4316_s27, %s4309_s26 }
 0x195   : > { %p4312_p11 = pnand %p4310_p10, %p4655_p8 }
 0x196   : > { %p4319_p2 = por %p4318_p0, %p4317_p13 }
 0x197   : > { %p4313_p12 = pneg %p4312_p11 }
 0x199   : > { %p4320_p5 = pnand %p4319_p2, %p4313_p12 }
 0x19b   : > { %4323 = shalt.err (!%p4320_p5)
}
 0x19c   : > { %s5386_s24 = sld [smem:[#allocation52_spill]]  ;;  %s5387_s18 = sld [smem:[#allocation51_spill]] }
 0x19d   : > { %s5388_s28 = sld [smem:[#allocation49_spill]]  ;;  %s5389_s30 = sld [smem:[#allocation48_spill]] }
 0x19e   : > { %s5390_s20 = sld [smem:[#allocation47_spill]]  ;;  %s5391_s0 = sld [smem:[#allocation53_spill]] }
 0x19f   : > { %3724 = dma.hbm_to_vmem [thread:$0]  (!%p4639_p6), %s5342_s16, 16, %s641_s23, [#allocation34]  }
 0x1a2   : > { %s3276_s17 = sadd.s32 4294967294, %s5386_s24   ;;  %s53_s19 = sadd.s32 1, %s5387_s18 }
 0x1a3   : > { %p55_p8 = scmp.ge.s32.totalorder %s53_s19, 2  ;;  %s62_s22 = sadd.s32 1, %s5388_s28 }
 0x1a4   : > { %p69_p7 = scmp.ne.s32.totalorder %s5388_s28, %s5389_s30  ;;  %p70_p9 = scmp.eq.s32.totalorder %s5386_s24, 0 }
 0x1a5   : > { %s5420_s19 = smov (%p55_p8, %s53_s19), 0  ;;  %p75_p1 = scmp.ne.s32.totalorder %s5389_s30, %s5390_s20 }
 0x1a6   : > { %p4973_p4 = por %p70_p9, %p69_p7  ;;  %s57_s23 = ssub.s32 %s5387_s18, %s5420_s19 }
 0x1a7   : > { %s5393_s25 = sadd.s32 4294967295, %s5386_s24   ;;  %p60_p3 = scmp.eq.s32.totalorder %s57_s23, 0 }
 0x1a8   : > { %p437_p6 = scmp.eq.s32.totalorder %s5393_s25, 1  ;;  %p5394_p10 = scmp.ne.s32.totalorder %s5391_s0, 0 }
 0x1a9   : > { %p443_p13 = scmp.eq.s32.totalorder %s3276_s17, 1  ;;  %p3749_p2 = scmp.lt.s32.totalorder %s5386_s24, 2 }
 0x1aa   : > { %p4985_p11 = por %p5394_p10, %p75_p1  ;;  %p4989_p12 = por %p437_p6, %p69_p7 }
 0x1ab   : > { %s4994_s27 = scalar_select %p60_p3, %s5388_s28, %s62_s22  }
 0x1ac   : > { %s5396_s26 = scalar_select %p4989_p12, 1, 0 }
 0x1ad   : > { %p4996_p0 = por %p443_p13, %p75_p1  ;;  %s651_s29 = sand.u32 1, %s5388_s28  }
 0x1ae   : > { %s3296_s30 = sshll.u32 %s5387_s18, 7  ;;  %s3295_s20 = sshll.u32 %s651_s29, 3 }
 0x1af   : > { %s5397_s21 = scalar_select %p4996_p0, 1, 0 }
 0x1b0   : > { %s5398_s25 = sld [smem:[#allocation55_spill]]  ;;  %s655_s17 = scalar_lea.vmem [#allocation9], %s3295_s20 }
 0x1b1   : > { %s663_s22 = sshll.u32 %s655_s17, 4  ;;  %p5010_p5 = pnand %p3749_p2, %p4973_p4  ;;  %s5014_s22 = int_to_ptr.vmem [resolvable:$true] %s663_s22 }
 0x1b2   : > { %s652_s24 = scalar_lea.sflag [#allocation10], %s651_s29 }
 0x1b3   : > { %p4326_p7 = pneg %p5010_p5 }
 0x1b6   : > { %s5399_s2 = smov %s5398_s25  ;;  %s5006_s4 = scalar_lea.hbm %s5398_s25, %s3296_s30 }
 0x1b7   : > { %s4324_s18 = scalar_lea.hbm %s5006_s4, 128  ;;  %s4329_s3 = scalar_lea.hbm %s5399_s2, 256 }
 0x1b8   : > { %p4325_p8 = scmp.ne.s32.totalorder %s5006_s4, %s4324_s18  ;;  %p4330_p4 = scmp.lt.u32.totalorder %s5006_s4, %s5399_s2 }
 0x1b9   : > { %p4331_p6 = scmp.lt.u32.totalorder %s4329_s3, %s4324_s18  ;;  %p4333_p10 = scmp.lt.u32.totalorder %s4324_s18, %s5006_s4 }
 0x1ba   : > { %p4327_p9 = pnand %p4326_p7, %p4325_p8 }
 0x1bb   : > { %p4332_p3 = por %p4331_p6, %p4330_p4 }
 0x1bc   : > { %p4328_p1 = pneg %p4327_p9 }
 0x1bd   : > { %p4334_p13 = por %p4333_p10, %p4332_p3 }
 0x1bf   : > { %p4335_p2 = pnand %p4334_p13, %p4328_p1 }
 0x1c1   : > { %4338 = shalt.err (!%p4335_p2)
}
 0x1c2   : > { %s4339_s29 = scalar_lea.vmem %s5014_s22, 128  ;;  %s4488_s23 = smov [#allocation9]  }
 0x1c3   : > { %p4340_p8 = scmp.ne.s32.totalorder %s5014_s22, %s4339_s29  ;;  %s4344_s25 = sshll.u32 %s4488_s23, 4  ;;  %s4345_s25 = int_to_ptr.vmem [resolvable:$false] %s4344_s25 }
 0x1c4   : > { %s4346_s17 = scalar_lea.vmem %s4345_s25, 256  ;;  %p4347_p12 = scmp.lt.s32.totalorder %s5014_s22, %s4345_s25 }
 0x1c5   : > { %p4342_p9 = pnand %p4340_p8, %p4326_p7  ;;  %p4348_p4 = scmp.lt.s32.totalorder %s4346_s17, %s4339_s29 }
 0x1c7   : > { %p4343_p0 = pneg %p4342_p9  ;;  %p4349_p6 = por %p4348_p4, %p4347_p12 }
 0x1c9   : > { %p4350_p3 = pnand %p4349_p6, %p4343_p0 }
 0x1cb   : > { %4353 = shalt.err (!%p4350_p3)
}
 0x1cc   : > { %3728 = dma.hbm_to_vmem [thread:$0]  (!%p5010_p5), %s5006_s4, 128, %s5014_s22, %s652_s24  }
 0x1cd   : > { %s5401_s18 = sld [smem:[#allocation54_spill]] }
 0x1d3   : > { %p5402_p1 = scmp.ne.s32.totalorder %s5401_s18, 0 }
 0x1d4   : > { %s5403_s28 = sld [smem:[#allocation48_spill]] (!%p5402_p1) }
 0x1d5   : > { %672 = sbr.rel (%p5402_p1) target bundleno = 3090 (0xc12), region = 88 }
 0x1da   : > { %s5044_s30 = sand.u32 (!%p5402_p1), 1, %s5403_s28  }
 0x1db   : > { %s3298_s3 = sshll.u32 (!%p5402_p1), %s5044_s30, 3  ;;  %s675_s20 = scalar_lea.sflag (!%p5402_p1), [#allocation10], %s5044_s30 }
 0x1dc   : > { %s678_s0 = scalar_lea.vmem [#allocation9], %s3298_s3 }
 0x1dd   : > { %4407 = dma.done.wait (%p4985_p11), %s675_s20, 128  }
 0x1de   : > { %4409 = vsyncadd (%p4985_p11), %s675_s20, 4294967168  ;;  %s5404_s4 = sld [smem:[#allocation53_spill]] }
 0x1e4   : > { %p5405_p12 = scmp.ne.s32.totalorder %s5404_s4, 0 }
 0x1e6   : > { %4411 = dma.done.wait (%p5405_p12), [#allocation13], 32  }
 0x1e7   : > { %4413 = vsyncadd (%p5405_p12), [#allocation13], 4294967264 }
 0x1e8   : > { %4415 = dma.done.wait (%p5405_p12), [#allocation16], 528  }
 0x1e9   : > { %4417 = vsyncadd (%p5405_p12), [#allocation16], 4294966768 }
 0x1ea   : > { %4419 = dma.done.wait (%p5405_p12), [#allocation19], 528  }
 0x1eb   : > { %4421 = vsyncadd (%p5405_p12), [#allocation19], 4294966768 }
 0x1ec   : > { %4423 = dma.done.wait (%p5405_p12), [#allocation22], 528  }
 0x1ed   : > { %4425 = vsyncadd (%p5405_p12), [#allocation22], 4294966768 }
 0x1ee   : > { %4427 = dma.done.wait (%p5405_p12), [#allocation25], 528  }
 0x1ef   : > { %4429 = vsyncadd (%p5405_p12), [#allocation25], 4294966768 }
 0x1f0   : > { %4431 = dma.done.wait (%p5405_p12), [#allocation28], 32  }
 0x1f1   : > { %4433 = vsyncadd (%p5405_p12), [#allocation28], 4294967264 }
 0x1f2   : > { %4435 = dma.done.wait (%p5405_p12), [#allocation31], 528  }
 0x1f3   : > { %4437 = vsyncadd (%p5405_p12), [#allocation31], 4294966768 }
 0x1f4   : > { %4439 = dma.done.wait (%p5405_p12), [#allocation34], 2064  }
 0x1f5   : > { %4441 = vsyncadd (%p5405_p12), [#allocation34], 4294965232  ;;  %vm796_vm0 = vcmask 261120   ;;  %v5086_v0 = vld [vmem:[%s678_s0] sm:$0xff]  ;;  %v825_v7 = vld [vmem:[#allocation15] sm:$0xff]  ;;  %v4489_v10 = vmov 0.0|0.0  }
 0x1f6   : > { %v797_v1 = vsel %vm796_vm0, %v5086_v0, 0.0  ;;  %v826_v8 = vld [vmem:[#allocation15 + $0x8] sm:$0xff]  ;;  %v827_v9 = vld [vmem:[#allocation15 + $0x10] sm:$0xff]  ;;  %3554 = vmatprep.subr.bf16.mxu1 %v4489_v10  ;;  %v828_v12 = vld [vmem:[#allocation15 + $0x18] sm:$0xff]  ;;  %vm4490_vm1 = vmmov 0   ;;  %v4491_v13 = vmov 0.0  }
 0x1f7   : > { %798 = vadd.xlane.f32.xlu0 %v797_v1  ;;  %v3555_v11 = vpack.c.bf16 %v826_v8, %v825_v7  ;;  %3432 = vmatprep.mubr.msk.f32.mxu1 %vm4490_vm1, %v4491_v13  ;;  %v3558_v14 = vpack.c.bf16 %v828_v12, %v827_v9  ;;  %v3316_v19 = vld [vmem:[#allocation12] ss:$0 sm:$0xff]  ;;  %v910_v21 = vld [vmem:[#allocation18] sm:$0xff]  ;;  %v911_v22 = vld [vmem:[#allocation18 + $0x8] sm:$0xff]  ;;  %vm1072_vm2 = vcmask 64512   ;;  %s4492_s5 = smov 120   ;;  %v1892_v1 = vlaneseq }
 0x1f8   : > { %3467 = vmatprep.subr.mxu0 %v4491_v13  ;;  %3469 = vmatprep.mubr.msk.f32.mxu0 %vm4490_vm1, %v4491_v13  ;;  %v3317_v23 = vld [vmem:[#allocation14] ss:$0 sm:$0xff]  ;;  %v3561_v25 = vpack.c.bf16 %v911_v22, %v910_v21  ;;  %v912_v27 = vld [vmem:[#allocation18 + $0x10] sm:$0xff]  ;;  %v991_v30 = vld [vmem:[#allocation21] sm:$0xff]  ;;  %1143 = vst.msk [vmem:[#allocation8] sm:$0xff] %vm1072_vm2, %v4491_v13  ;;  %s4493_s1 = smov 112  }
 0x1f9   : > { %3556 = vmatpush3.bf16.msra.mxu1 %v3555_v11  ;;  %v913_v28 = vld [vmem:[#allocation18 + $0x18] sm:$0xff]  ;;  %v992_v31 = vld [vmem:[#allocation21 + $0x8] sm:$0xff]  ;;  %1144 = vst.msk [vmem:[#allocation8 + $0x8] sm:$0xff] %vm1072_vm2, %v4491_v13  ;;  %1145 = vst.msk [vmem:[#allocation8 + $0x10] sm:$0xff] %vm1072_vm2, %v4491_v13  ;;  %s4494_s22 = smov 104   ;;  %vm1134_vm4 = vcmask 7168  }
 0x1fa   : > { %3557 = vmatprep.subr.bf16.mxu1 %v4489_v10  ;;  %v3564_v29 = vpack.c.bf16 %v913_v28, %v912_v27  ;;  %v3567_v32 = vpack.c.bf16 %v992_v31, %v991_v30  ;;  %v993_v33 = vld [vmem:[#allocation21 + $0x10] sm:$0xff]  ;;  %v994_v34 = vld [vmem:[#allocation21 + $0x18] sm:$0xff]  ;;  %1146 = vst.msk [vmem:[#allocation8 + $0x18] sm:$0xff] %vm1072_vm2, %v4491_v13  ;;  %v3322_v45 = vld [vmem:[#allocation23] ss:$0 sm:$0xff]  ;;  %v4496_v9 = vmov 0  }
 0x1fb   : > { %v3570_v35 = vpack.c.bf16 %v994_v34, %v993_v33  ;;  %v3318_v36 = vld [vmem:[#allocation17] ss:$0 sm:$0xff]  ;;  %v3320_v41 = vld [vmem:[#allocation20] ss:$0 sm:$0xff]  ;;  %1139 = vst.msk [vmem:[#allocation7] sm:$0xff] %vm1134_vm4, %v4491_v13  ;;  %1140 = vst.msk [vmem:[#allocation7 + $0x8] sm:$0xff] %vm1134_vm4, %v4491_v13  ;;  %3844 = vset.pattern.permute.xlu0 %v4496_v9  ;;  %3845 = vset.pattern.permute.xlu1 %v4496_v9 }
 0x1fc   : > { %1141 = vst.msk [vmem:[#allocation7 + $0x10] sm:$0xff] %vm1134_vm4, %v4491_v13  ;;  %1142 = vst.msk [vmem:[#allocation7 + $0x18] sm:$0xff] %vm1134_vm4, %v4491_v13  ;;  %s4497_s24 = smov 8   ;;  %s4498_s29 = smov 16   ;;  %vm2680_vm5 = vcmask 130112   ;;  %vm2686_vm6 = vcmask 195712  }
 0x1fd   : > { %3559 = vmatpush3.bf16.msra.mxu1 %v3558_v14  ;;  %s4499_s23 = smov 24   ;;  %vm2692_vm7 = vcmask 261312   ;;  %s5406_s25 = sld [smem:[#allocation50_spill]] }
 0x1fe   : > { %3560 = vmatprep.subr.bf16.mxu1 %v4489_v10  ;;  %s792_s18 = scalar_lea.vmem [#allocation36], %s3298_s3  ;;  %s5407_s4 = sld [smem:[#allocation61_spill]] }
 0x1ff   : > { %s3012_s28 = sshll.u32 %s792_s18, 4  ;;  %p5408_p0 = scmp.ne.s32.totalorder %s5396_s26, 0  ;;  %s5278_s28 = int_to_ptr.vmem [resolvable:$true] %s3012_s28 }
 0x200   : > { %s4500_s3 = smov [#allocation36]  }
 0x203   : > { %s3363_s17 = sshll.u32 %s5406_s25, 7 }
 0x284   : > { %v799_v2 = vpop.xlane.xlu0 %798 }
 0x285   : > { %v801_v3 = vmul.f32 0.03125, %v799_v2  ;;  %v1893_v2 = vshrl.u32 %v1892_v1, 7 }
 0x287   : > { %v802_v4 = vsub.f32 %v5086_v0, %v801_v3  ;;  %v1895_v3 = vand.u32 127, %v1892_v1 }
 0x289   : > { %v803_v5 = vmul.f32 %v802_v4, %v802_v4  ;;  %vm1904_vm3 = vcmp.ge.s32.totalorder %v1893_v2, %v1895_v3 }
 0x28b   : > { %v804_v6 = vsel %vm796_vm0, %v803_v5, 0.0  ;;  %v4495_v5 = vmov -1e+30  }
 0x28c   : > { %805 = vadd.xlane.f32.xlu0 %v804_v6  ;;  %1135 = vst.msk [vmem:[#allocation6] sm:$0xff] %vm1134_vm4, %v4495_v5  ;;  %1136 = vst.msk [vmem:[#allocation6 + $0x8] sm:$0xff] %vm1134_vm4, %v4495_v5 }
 0x28d   : > { %1137 = vst.msk [vmem:[#allocation6 + $0x10] sm:$0xff] %vm1134_vm4, %v4495_v5  ;;  %1138 = vst.msk [vmem:[#allocation6 + $0x18] sm:$0xff] %vm1134_vm4, %v4495_v5 }
 0x293   : > { %v5190_v28 = vld [vmem:[#allocation6 + $0x8] sm:$0xff] }
 0x319   : > { %v806_v15 = vpop.xlane.xlu0 %805 }
 0x31a   : > { %v807_v16 = vmul.f32 0.03125, %v806_v15 }
 0x31c   : > { %v808_v17 = vadd.f32 1e-05, %v807_v16 }
 0x31e   : > { %3846 = vrsqrt.f32 %v808_v17 }
 0x328   : > { %v3847_v18 = vpop.eup %3846 }
 0x329   : > { %v810_v20 = vmul.f32 %v3847_v18, %v802_v4 }
 0x32b   : > { %v817_v24 = vmul.f32 %v3316_v19, %v810_v20 }
 0x32d   : > { %v824_v26 = vadd.f32 %v3317_v23, %v817_v24  ;;  %v5180_v24 = vld [vmem:[#allocation6] sm:$0xff] }
 0x32f   : > { %3433 = vmatmul.mubr.msk.f32.vlgmr.msra.gmra.mrb[0].mxu1 %vm796_vm0, %v824_v26 }
 0x330   : > { %3562 = vmatpush3.bf16.msra.mxu1 %v3561_v25  ;;  %3443 = vmatprep.mubr.msk.f32.mxu1 %vm4490_vm1, %v4491_v13 }
 0x331   : > { %3563 = vmatprep.subr.bf16.mxu1 %v4489_v10 }
 0x334   : > { %3565 = vmatpush3.bf16.msra.mxu1 %v3564_v29  ;;  %v2217_v29 = vld [vmem:[#allocation6 + $0x10] sm:$0xff] }
 0x335   : > { %3566 = vmatprep.subr.bf16.mxu1 %v4489_v10 }
 0x337   : > { %3444 = vmatmul.mubr.msk.f32.vlgmr.msra.gmra.mrb[2].mxu1 %vm796_vm0, %v824_v26 }
 0x338   : > { %3568 = vmatpush3.bf16.msra.mxu1 %v3567_v32  ;;  %3454 = vmatprep.mubr.msk.f32.mxu1 %vm4490_vm1, %v4491_v13 }
 0x339   : > { %3569 = vmatprep.subr.bf16.mxu1 %v4489_v10 }
 0x33c   : > { %3571 = vmatpush3.bf16.msra.mxu1 %v3570_v35 }
 0x33d   : > { %3457 = vmatprep.subr.mxu1 %v4491_v13 }
 0x33f   : > { %3455 = vmatmul.mubr.msk.f32.vlgmr.msra.gmra.mrb[4].mxu1 %vm796_vm0, %v824_v26 }
 0x340   : > { %3459 = vmatprep.mubr.msk.f32.mxu1 %vm4490_vm1, %v4491_v13 }
 0x402   : > { %v905_v37 = vpop.f32.mrb[0].mxu1 }
 0x403   : > { %v906_v38 = vadd.f32 %v3318_v36, %v905_v37  ;;  %v3434_v39 = vpop.f32.mrb[1].mxu1  ;;  %v2218_v36 = vld [vmem:[#allocation6 + $0x18] sm:$0xff] }
 0x405   : > { %v909_v40 = vmul.f32 0.35355338, %v906_v38 }
 0x407   : > { %1073 = vst.msk [vmem:[#allocation4] sm:$0xff] %vm1072_vm2, %v909_v40  ;;  %1080 = vrot.lane.b32.xlu1 %v909_v40, %s4492_s5 }
 0x40a   : > { %v987_v42 = vpop.f32.mrb[2].mxu1 }
 0x40b   : > { %v988_v43 = vadd.f32 %v3320_v41, %v987_v42  ;;  %v3445_v44 = vpop.f32.mrb[3].mxu1 }
 0x40d   : > { %1076 = vst.msk [vmem:[#allocation2] sm:$0xff] %vm1072_vm2, %v988_v43  ;;  %1103 = vrot.lane.b32.xlu0 %v988_v43, %s4493_s1  ;;  %1086 = vrot.lane.b32.xlu1 %v988_v43, %s4492_s5 }
 0x40e   : > { %v1130_v50 = vld [vmem:[#allocation4] sm:$0xff] }
 0x411   : > { %1098 = vrot.lane.b32.xlu1 %v909_v40, %s4493_s1 }
 0x412   : > { %v1068_v46 = vpop.f32.mrb[4].mxu1 }
 0x413   : > { %v5127_v47 = vadd.f32 %v3322_v45, %v1068_v46  ;;  %v3456_v48 = vpop.f32.mrb[5].mxu1 }
 0x414   : > { %v1896_v49 = vld [vmem:[#allocation2] sm:$0xff] }
 0x415   : > { %1078 = vst.msk [vmem:[#allocation3] sm:$0xff] %vm1072_vm2, %v5127_v47  ;;  %1119 = vrot.lane.b32.xlu1 %v988_v43, %s4494_s22  ;;  %3458 = vmatpush3.xpose.msk.msra.mxu1 %vm1072_vm2, %v1896_v49 }
 0x416   : > { %3462 = vmatprep.subr.mxu1 %v4491_v13 }
 0x418   : > { %3460 = vmatmul.mubr.msk.f32.vlgmr.msra.gmra.mrb[6].mxu1 %vm1072_vm2, %v1130_v50 }
 0x419   : > { %1114 = vrot.lane.b32.xlu1 %v909_v40, %s4494_s22  ;;  %3464 = vmatprep.mubr.msk.f32.mxu1 %vm4490_vm1, %v4491_v13 }
 0x41c   : > { %v1900_v61 = vld [vmem:[#allocation3] sm:$0xff] }
 0x479   : > { %v1081_v51 = vpop.permute.xlu1 %1080 }
 0x47a   : > { %1084 = vst.msk [vmem:[#allocation4 + $0x8] sm:$0xff] %vm1072_vm2, %v1081_v51 }
 0x47f   : > { %v1104_v52 = vpop.permute.xlu0 %1103  ;;  %v1087_v53 = vpop.permute.xlu1 %1086 }
 0x480   : > { %3326 = vst.msk [vmem:[#allocation2 + $0x10] sm:$0xff] %vm1072_vm2, %v1104_v52  ;;  %3324 = vst.msk [vmem:[#allocation2 + $0x8] sm:$0xff] %vm1072_vm2, %v1087_v53 }
 0x481   : > { %v1131_v58 = vld [vmem:[#allocation4 + $0x8] sm:$0xff] }
 0x483   : > { %v1099_v54 = vpop.permute.xlu1 %1098 }
 0x484   : > { %1102 = vst.msk [vmem:[#allocation4 + $0x10] sm:$0xff] %vm1072_vm2, %v1099_v54 }
 0x487   : > { %v1120_v55 = vpop.permute.xlu1 %1119  ;;  %v1897_v56 = vld [vmem:[#allocation2 + $0x8] sm:$0xff]  ;;  %v1898_v57 = vld [vmem:[#allocation2 + $0x10] sm:$0xff] }
 0x488   : > { %3328 = vst.msk [vmem:[#allocation2 + $0x18] sm:$0xff] %vm1072_vm2, %v1120_v55  ;;  %3463 = vmatpush3.xpose.msk.msra.mxu1 %vm1072_vm2, %v1897_v56  ;;  %3468 = vmatpush3.xpose.msk.msra.mxu0 %vm1072_vm2, %v1898_v57 }
 0x489   : > { %3477 = vmatprep.subr.mxu0 %v4491_v13  ;;  %3472 = vmatprep.subr.mxu1 %v4491_v13 }
 0x48b   : > { %v1115_v59 = vpop.permute.xlu1 %1114  ;;  %3465 = vmatmul.mubr.msk.f32.vlgmr.msra.gmra.mrb[8].mxu1 %vm1072_vm2, %v1131_v58  ;;  %v1132_v60 = vld [vmem:[#allocation4 + $0x10] sm:$0xff] }
 0x48c   : > { %1118 = vst.msk [vmem:[#allocation4 + $0x18] sm:$0xff] %vm1072_vm2, %v1115_v59  ;;  %3470 = vmatmul.mubr.msk.f32.vlgmr.msra.gmra.mrb[0].mxu0 %vm1072_vm2, %v1132_v60  ;;  %3474 = vmatprep.mubr.msk.f32.mxu1 %vm4490_vm1, %v4491_v13 }
 0x48d   : > { %3478 = vmatpush3.msra.mxu0 %v1900_v61  ;;  %3479 = vmatprep.mubr.msk.f32.mxu0 %vm4490_vm1, %v4491_v13 }
 0x48e   : > { %3487 = vmatprep.subr.mxu0 %v4491_v13 }
 0x48f   : > { %v1899_v62 = vld [vmem:[#allocation2 + $0x18] sm:$0xff] }
 0x490   : > { %3473 = vmatpush3.xpose.msk.msra.mxu1 %vm1072_vm2, %v1899_v62 }
 0x491   : > { %3482 = vmatprep.subr.mxu1 %v4491_v13 }
 0x493   : > { %v1133_v63 = vld [vmem:[#allocation4 + $0x18] sm:$0xff] }
 0x494   : > { %3475 = vmatmul.mubr.msk.f32.vlgmr.msra.gmra.mrb[10].mxu1 %vm1072_vm2, %v1133_v63 }
 0x495   : > { %3484 = vmatprep.mubr.msk.f32.mxu1 %vm4490_vm1, %v4491_v13 }
 0x4eb   : > { %v1977_v4 = vpop.f32.mrb[6].mxu1 }
 0x4ec   : > { %v2211_v6 = vsel %vm1904_vm3, %v1977_v4, -1e+30  ;;  %v3461_v7 = vpop.f32.mrb[7].mxu1 }
 0x4ed   : > { %v2219_v8 = vsel %vm1072_vm2, %v2211_v6, -inf }
 0x4ee   : > { %2220 = vmax.xlane.f32.xlu1 %v2219_v8 }
 0x55e   : > { %v2053_v11 = vpop.f32.mrb[8].mxu1 }
 0x55f   : > { %v2212_v12 = vsel %vm1904_vm3, %v2053_v11, -1e+30  ;;  %v3466_v14 = vpop.f32.mrb[9].mxu1  ;;  %v2129_v15 = vpop.f32.mrb[0].mxu0 }
 0x560   : > { %v2213_v16 = vsel %vm1904_vm3, %v2129_v15, -1e+30  ;;  %v3471_v17 = vpop.f32.mrb[1].mxu0  ;;  %v2222_v18 = vsel %vm1072_vm2, %v2212_v12, -inf  ;;  %v2280_v14 = vld [vmem:[#allocation7 + $0x8] sm:$0xff] }
 0x561   : > { %2223 = vmax.xlane.f32.xlu0 %v2222_v18  ;;  %v2225_v19 = vsel %vm1072_vm2, %v2213_v16, -inf  ;;  %v2281_v18 = vld [vmem:[#allocation7 + $0x10] sm:$0xff] }
 0x562   : > { %2226 = vmax.xlane.f32.xlu1 %v2225_v19  ;;  %v2279_v19 = vld [vmem:[#allocation7] sm:$0xff] }
 0x567   : > { %v2205_v20 = vpop.f32.mrb[10].mxu1 }
 0x568   : > { %v2214_v21 = vsel %vm1904_vm3, %v2205_v20, -1e+30  ;;  %v3476_v22 = vpop.f32.mrb[11].mxu1 }
 0x569   : > { %v2228_v23 = vsel %vm1072_vm2, %v2214_v21, -inf }
 0x56a   : > { %2229 = vmax.xlane.f32.xlu1 %v2228_v23 }
 0x57b   : > { %v2221_v25 = vpop.xlane.xlu1 %2220 }
 0x57c   : > { %v5183_v26 = vmax.f32 %v5180_v24, %v2221_v25 }
 0x57e   : > { %v2235_v27 = vsub.f32 %v5180_v24, %v5183_v26  ;;  %2635 = vst.msk [vmem:[#allocation6] sm:$0xff] %vm1134_vm4, %v5183_v26  ;;  %2249 = vperm.xlu0 %3844, %v5183_v26  }
 0x5ee   : > { %v2224_v30 = vpop.xlane.xlu0 %2223 }
 0x5ef   : > { %v5193_v31 = vmax.f32 %v5190_v28, %v2224_v30  ;;  %v2227_v32 = vpop.xlane.xlu1 %2226  ;;  %v2282_v30 = vld [vmem:[#allocation7 + $0x18] sm:$0xff] }
 0x5f0   : > { %v2233_v33 = vmax.f32 %v2217_v29, %v2227_v32 }
 0x5f1   : > { %v2236_v34 = vsub.f32 %v5190_v28, %v5193_v31  ;;  %2636 = vst.msk [vmem:[#allocation6 + $0x8] sm:$0xff] %vm1134_vm4, %v5193_v31  ;;  %2254 = vperm.xlu1 %3845, %v5193_v31  }
 0x5f2   : > { %v2237_v35 = vsub.f32 %v2217_v29, %v2233_v33  ;;  %2637 = vst.msk [vmem:[#allocation6 + $0x10] sm:$0xff] %vm1134_vm4, %v2233_v33 }
 0x5f3   : > { %v2241_v5 = vmul.f32 1.442695, %v2236_v34 }
 0x5f4   : > { %v2243_v62 = vmul.f32 1.442695, %v2237_v35 }
 0x5f5   : > { %2259 = vperm.xlu1 %3845, %v2233_v33  }
 0x5f7   : > { %v2230_v37 = vpop.xlane.xlu1 %2229 }
 0x5f8   : > { %v2234_v38 = vmax.f32 %v2218_v36, %v2230_v37 }
 0x5fa   : > { %v2238_v39 = vsub.f32 %v2218_v36, %v2234_v38  ;;  %2638 = vst.msk [vmem:[#allocation6 + $0x18] sm:$0xff] %vm1134_vm4, %v2234_v38  ;;  %2264 = vperm.xlu1 %3845, %v2234_v38  }
 0x5fc   : > { %v2245_v3 = vmul.f32 1.442695, %v2238_v39  ;;  %v2308_v39 = vld [vmem:[#allocation8 + $0x8] sm:$0xff] }
 0x5fd   : > { %v2250_v40 = vpop.permute.xlu0 %2249 }
 0x5fe   : > { %v2267_v41 = vsub.f32 %v2211_v6, %v2250_v40  ;;  %1093 = vrot.lane.b32.xlu1 %v5127_v47, %s4492_s5  ;;  %s5276_s5 = scalar_lea.hbm %s5407_s4, %s3363_s17 }
 0x600   : > { %v2271_v42 = vmul.f32 1.442695, %v2267_v41 }
 0x602   : > { %3848 = vpow2.f32 %v2271_v42  ;;  %1109 = vrot.lane.b32.xlu1 %v5127_v47, %s4493_s1  ;;  %s2998_s1 = scalar_lea.sflag [#allocation11], %s5044_s30 }
 0x606   : > { %1125 = vrot.lane.b32.xlu1 %v5127_v47, %s4494_s22  ;;  %s4354_s22 = scalar_lea.vmem %s5278_s28, 128 }
 0x607   : > { %p4355_p11 = scmp.ne.s32.totalorder %s5278_s28, %s4354_s22 }
 0x609   : > { %p4356_p5 = pnand %p4355_p11, %p5408_p0 }
 0x60b   : > { %p4357_p7 = pneg %p4356_p5 }
 0x60c   : > { %v3849_v43 = vpop.eup %3848 }
 0x60d   : > { %3480 = vmatmul.mubr.msk.f32.vlgmr.msra.gmra.mrb[2].mxu0 %vm1072_vm2, %v3849_v43  ;;  %v2287_v58 = vsel %vm1072_vm2, %v3849_v43, 0.0  ;;  %v2309_v43 = vld [vmem:[#allocation8 + $0x10] sm:$0xff] }
 0x60e   : > { %3489 = vmatprep.mubr.msk.f32.mxu0 %vm4490_vm1, %v4491_v13 }
 0x670   : > { %v2255_v44 = vpop.permute.xlu1 %2254 }
 0x671   : > { %v2268_v45 = vsub.f32 %v2212_v12, %v2255_v44  ;;  %v2239_v12 = vmul.f32 1.442695, %v2235_v27 }
 0x673   : > { %v2273_v46 = vmul.f32 1.442695, %v2268_v45 }
 0x674   : > { %v2260_v48 = vpop.permute.xlu1 %2259 }
 0x675   : > { %3850 = vpow2.f32 %v2273_v46  ;;  %v2269_v49 = vsub.f32 %v2213_v16, %v2260_v48 }
 0x677   : > { %v2275_v50 = vmul.f32 1.442695, %v2269_v49  ;;  %v2310_v49 = vld [vmem:[#allocation8 + $0x18] sm:$0xff] }
 0x679   : > { %3852 = vpow2.f32 %v2275_v50  ;;  %v2265_v51 = vpop.permute.xlu1 %2264 }
 0x67a   : > { %v2270_v52 = vsub.f32 %v2214_v21, %v2265_v51 }
 0x67c   : > { %v2277_v53 = vmul.f32 1.442695, %v2270_v52 }
 0x67d   : > { %v1094_v54 = vpop.permute.xlu1 %1093 }
 0x67e   : > { %3854 = vpow2.f32 %v2277_v53  ;;  %3325 = vst.msk [vmem:[#allocation3 + $0x8] sm:$0xff] %vm1072_vm2, %v1094_v54 }
 0x67f   : > { %v3851_v47 = vpop.eup %3850  ;;  %3856 = vpow2.f32 %v2243_v62 }
 0x680   : > { %v2290_v55 = vsel %vm1072_vm2, %v3851_v47, 0.0  ;;  %3858 = vpow2.f32 %v2245_v3 }
 0x681   : > { %2291 = vadd.xlane.f32.xlu1 %v2290_v55  ;;  %v1110_v56 = vpop.permute.xlu1 %1109  ;;  %3860 = vpow2.f32 %v2241_v5 }
 0x682   : > { %3327 = vst.msk [vmem:[#allocation3 + $0x10] sm:$0xff] %vm1072_vm2, %v1110_v56  ;;  %3862 = vpow2.f32 %v2239_v12 }
 0x683   : > { %v3853_v57 = vpop.eup %3852 }
 0x684   : > { %v2293_v59 = vsel %vm1072_vm2, %v3853_v57, 0.0 }
 0x685   : > { %2288 = vadd.xlane.f32.xlu1 %v2287_v58  ;;  %2294 = vadd.xlane.f32.xlu0 %v2293_v59  ;;  %v1126_v60 = vpop.permute.xlu1 %1125  ;;  %v1901_v61 = vld [vmem:[#allocation3 + $0x8] sm:$0xff] }
 0x686   : > { %3329 = vst.msk [vmem:[#allocation3 + $0x18] sm:$0xff] %vm1072_vm2, %v1126_v60  ;;  %3483 = vmatpush3.msra.mxu1 %v1901_v61  ;;  %v2696_v58 = vld [vmem:[#allocation24 + $0x8] sm:$0xff]  ;;  %v2697_v60 = vld [vmem:[#allocation24 + $0x10] sm:$0xff]  ;;  %v2698_v61 = vld [vmem:[#allocation24 + $0x18] sm:$0xff] }
 0x687   : > { %3485 = vmatmul.mubr.msk.f32.vlgmr.msra.gmra.mrb[12].mxu1 %vm1072_vm2, %v3851_v47  ;;  %3492 = vmatprep.subr.mxu1 %v4491_v13 }
 0x688   : > { %v3855_v63 = vpop.eup %3854  ;;  %3494 = vmatprep.mubr.msk.f32.mxu1 %vm4490_vm1, %v4491_v13 }
 0x689   : > { %v2296_v1 = vsel %vm1072_vm2, %v3855_v63, 0.0  ;;  %v1902_v2 = vld [vmem:[#allocation3 + $0x10] sm:$0xff]  ;;  %v3857_v6 = vpop.eup %3856 }
 0x68a   : > { %2297 = vadd.xlane.f32.xlu0 %v2296_v1  ;;  %3488 = vmatpush3.msra.mxu0 %v1902_v2  ;;  %v3859_v7 = vpop.eup %3858  ;;  %v2285_v21 = vmul.f32 %v3857_v6, %v2281_v18  ;;  %v3576_v2 = vpack.c.bf16 %v2698_v61, %v2697_v60  ;;  %v2912_v60 = vld [vmem:[#allocation33 + $0x50] sm:$0xff] }
 0x68b   : > { %3490 = vmatmul.mubr.msk.f32.vlgmr.msra.gmra.mrb[4].mxu0 %vm1072_vm2, %v3853_v57  ;;  %3572 = vmatprep.subr.bf16.mxu0 %v4489_v10  ;;  %v3861_v8 = vpop.eup %3860  ;;  %v2286_v24 = vmul.f32 %v3859_v7, %v2282_v30  ;;  %v2695_v57 = vld [vmem:[#allocation24] sm:$0xff] }
 0x68c   : > { %3505 = vmatprep.mubr.msk.f32.mxu0 %vm4490_vm1, %v4491_v13  ;;  %v2284_v15 = vmul.f32 %v3861_v8, %v2280_v14  ;;  %v3863_v16 = vpop.eup %3862  ;;  %v3573_v59 = vpack.c.bf16 %v2696_v58, %v2695_v57  ;;  %v2910_v58 = vld [vmem:[#allocation33 + $0x40] sm:$0xff] }
 0x68d   : > { %v1903_v4 = vld [vmem:[#allocation3 + $0x18] sm:$0xff]  ;;  %v2283_v22 = vmul.f32 %v3863_v16, %v2279_v19 }
 0x68e   : > { %3493 = vmatpush3.msra.mxu1 %v1903_v4  ;;  %3574 = vmatpush3.bf16.msra.mxu0 %v3573_v59  ;;  %v2911_v59 = vld [vmem:[#allocation33 + $0x48] sm:$0xff] }
 0x68f   : > { %3495 = vmatmul.mubr.msk.f32.vlgmr.msra.gmra.mrb[14].mxu1 %vm1072_vm2, %v3855_v63  ;;  %3578 = vmatprep.subr.bf16.mxu1 %v4489_v10  ;;  %v3597_v61 = vpack.c.bf16 %v2911_v59, %v2910_v58 }
 0x690   : > { %3516 = vmatprep.mubr.msk.f32.mxu1 %vm4490_vm1, %v4491_v13  ;;  %3575 = vmatprep.subr.bf16.mxu0 %v4489_v10 }
 0x692   : > { %3577 = vmatpush3.bf16.msra.mxu0 %v3576_v2  ;;  %v2915_v2 = vld [vmem:[#allocation33 + $0x68] sm:$0xff] }
 0x693   : > { %3584 = vmatprep.subr.bf16.mxu0 %v4489_v10 }
 0x696   : > { %2323 = vperm.xlu1 %3845, %v3857_v6   ;;  %v2307_v6 = vld [vmem:[#allocation8] sm:$0xff] }
 0x69a   : > { %2328 = vperm.xlu1 %3845, %v3859_v7  }
 0x6a0   : > { %2318 = vperm.xlu0 %3844, %v3861_v8  }
 0x6e0   : > { %v5233_v9 = vpop.f32.mrb[2].mxu0 }
 0x6e1   : > { %v3481_v11 = vpop.f32.mrb[3].mxu0 }
 0x70e   : > { %v2292_v17 = vpop.xlane.xlu1 %2291 }
 0x70f   : > { %v2300_v20 = vadd.f32 %v2292_v17, %v2284_v15 }
 0x711   : > { %2304 = vst.msk [vmem:[#allocation7 + $0x8] sm:$0xff] %vm1134_vm4, %v2300_v20 }
 0x712   : > { %v2295_v23 = vpop.xlane.xlu0 %2294  ;;  %v2289_v25 = vpop.xlane.xlu1 %2288 }
 0x713   : > { %v2301_v28 = vadd.f32 %v2295_v23, %v2285_v21  ;;  %v2299_v29 = vadd.f32 %v2289_v25, %v2283_v22 }
 0x715   : > { %2305 = vst.msk [vmem:[#allocation7 + $0x10] sm:$0xff] %vm1134_vm4, %v2301_v28  ;;  %2303 = vst.msk [vmem:[#allocation7] sm:$0xff] %vm1134_vm4, %v2299_v29 }
 0x716   : > { %v2324_v41 = vpop.permute.xlu1 %2323 }
 0x717   : > { %v2298_v26 = vpop.xlane.xlu0 %2297  ;;  %v2333_v48 = vmul.f32 %v2324_v41, %v2309_v43 }
 0x718   : > { %v2302_v27 = vadd.f32 %v2298_v26, %v2286_v24  ;;  %v2640_v31 = vld [vmem:[#allocation7 + $0x8] sm:$0xff] }
 0x719   : > { %3864 = vrcp.f32 %v2640_v31 }
 0x71a   : > { %2306 = vst.msk [vmem:[#allocation7 + $0x18] sm:$0xff] %vm1134_vm4, %v2302_v27  ;;  %v2329_v50 = vpop.permute.xlu1 %2328 }
 0x71b   : > { %v2334_v54 = vmul.f32 %v2329_v50, %v2310_v49  ;;  %v2904_v50 = vld [vmem:[#allocation33 + $0x10] sm:$0xff] }
 0x71c   : > { %v2641_v32 = vld [vmem:[#allocation7 + $0x10] sm:$0xff]  ;;  %v2639_v35 = vld [vmem:[#allocation7] sm:$0xff] }
 0x71d   : > { %3866 = vrcp.f32 %v2641_v32 }
 0x71f   : > { %v2319_v40 = vpop.permute.xlu0 %2318 }
 0x720   : > { %v2332_v42 = vmul.f32 %v2319_v40, %v2308_v39 }
 0x721   : > { %v2642_v33 = vld [vmem:[#allocation7 + $0x18] sm:$0xff] }
 0x722   : > { %3868 = vrcp.f32 %v2642_v33  ;;  %v2810_v33 = vld [vmem:[#allocation30 + $0x8] sm:$0xff] }
 0x723   : > { %v3865_v34 = vpop.eup %3864  ;;  %3870 = vrcp.f32 %v2639_v35  ;;  %v2812_v35 = vld [vmem:[#allocation30 + $0x18] sm:$0xff] }
 0x724   : > { %2658 = vperm.xlu0 %3844, %v3865_v34  }
 0x727   : > { %v3867_v36 = vpop.eup %3866 }
 0x728   : > { %2663 = vperm.xlu1 %3845, %v3867_v36  }
 0x72c   : > { %v3869_v37 = vpop.eup %3868  ;;  %2313 = vperm.xlu1 %3845, %v3863_v16  }
 0x72d   : > { %2668 = vperm.xlu0 %3844, %v3869_v37   ;;  %v3871_v38 = vpop.eup %3870  ;;  %v2902_v37 = vld [vmem:[#allocation33] sm:$0xff] }
 0x731   : > { %2653 = vperm.xlu0 %3844, %v3871_v38   ;;  %v2903_v38 = vld [vmem:[#allocation33 + $0x8] sm:$0xff] }
 0x732   : > { %v3585_v39 = vpack.c.bf16 %v2903_v38, %v2902_v37 }
 0x75a   : > { %v2477_v44 = vpop.f32.mrb[12].mxu1 }
 0x75b   : > { %v2628_v45 = vadd.f32 %v2477_v44, %v2332_v42  ;;  %v3486_v46 = vpop.f32.mrb[13].mxu1  ;;  %v3357_v44 = vld [vmem:[#allocation27] ss:$0 sm:$0xff] }
 0x75c   : > { %v3358_v46 = vld [vmem:[#allocation29] ss:$0 sm:$0xff] }
 0x75d   : > { %2632 = vst.msk [vmem:[#allocation8 + $0x8] sm:$0xff] %vm1072_vm2, %v2628_v45 }
 0x75e   : > { %v2550_v51 = vpop.f32.mrb[4].mxu0 }
 0x75f   : > { %v2629_v52 = vadd.f32 %v2550_v51, %v2333_v48  ;;  %v3491_v53 = vpop.f32.mrb[5].mxu0  ;;  %v2905_v51 = vld [vmem:[#allocation33 + $0x18] sm:$0xff] }
 0x760   : > { %v2906_v53 = vld [vmem:[#allocation33 + $0x20] sm:$0xff] }
 0x761   : > { %2633 = vst.msk [vmem:[#allocation8 + $0x10] sm:$0xff] %vm1072_vm2, %v2629_v52  ;;  %v3588_v52 = vpack.c.bf16 %v2905_v51, %v2904_v50 }
 0x762   : > { %v2623_v47 = vpop.f32.mrb[14].mxu1 }
 0x763   : > { %v2630_v55 = vadd.f32 %v2623_v47, %v2334_v54  ;;  %v3496_v56 = vpop.f32.mrb[15].mxu1  ;;  %v2907_v54 = vld [vmem:[#allocation33 + $0x28] sm:$0xff] }
 0x764   : > { %v2648_v63 = vld [vmem:[#allocation8 + $0x8] sm:$0xff]  ;;  %v3591_v47 = vpack.c.bf16 %v2907_v54, %v2906_v53  ;;  %v2909_v56 = vld [vmem:[#allocation33 + $0x38] sm:$0xff] }
 0x765   : > { %2634 = vst.msk [vmem:[#allocation8 + $0x18] sm:$0xff] %vm1072_vm2, %v2630_v55  ;;  %v2908_v55 = vld [vmem:[#allocation33 + $0x30] sm:$0xff] }
 0x766   : > { %v3594_v57 = vpack.c.bf16 %v2909_v56, %v2908_v55 }
 0x768   : > { %v2649_v3 = vld [vmem:[#allocation8 + $0x10] sm:$0xff] }
 0x76c   : > { %v2650_v12 = vld [vmem:[#allocation8 + $0x18] sm:$0xff] }
 0x7a3   : > { %v2659_v62 = vpop.permute.xlu0 %2658 }
 0x7a4   : > { %v2672_v1 = vmul.f32 %v2659_v62, %v2648_v63  ;;  %v2913_v62 = vld [vmem:[#allocation33 + $0x58] sm:$0xff] }
 0x7a5   : > { %v3600_v63 = vpack.c.bf16 %v2913_v62, %v2912_v60 }
 0x7a6   : > { %2677 = vrot.lane.b32.xlu1 %v2672_v1, %s4497_s24  ;;  %v2914_v1 = vld [vmem:[#allocation33 + $0x60] sm:$0xff]  ;;  %s4358_s24 = sshll.u32 %s4500_s3, 4  ;;  %s4359_s24 = int_to_ptr.vmem [resolvable:$false] %s4358_s24 }
 0x7a7   : > { %v2664_v4 = vpop.permute.xlu1 %2663  ;;  %p4361_p10 = scmp.lt.s32.totalorder %s5278_s28, %s4359_s24 }
 0x7a8   : > { %v2673_v5 = vmul.f32 %v2664_v4, %v2649_v3  ;;  %v3603_v3 = vpack.c.bf16 %v2915_v2, %v2914_v1  ;;  %v2916_v4 = vld [vmem:[#allocation33 + $0x70] sm:$0xff] }
 0x7aa   : > { %2683 = vrot.lane.b32.xlu0 %v2673_v5, %s4498_s29  ;;  %v2917_v5 = vld [vmem:[#allocation33 + $0x78] sm:$0xff]  ;;  %s4360_s29 = scalar_lea.vmem %s4359_s24, 256 }
 0x7ab   : > { %v2314_v7 = vpop.permute.xlu1 %2313  ;;  %p4362_p13 = scmp.lt.s32.totalorder %s4360_s29, %s4354_s22 }
 0x7ac   : > { %v2331_v8 = vmul.f32 %v2314_v7, %v2307_v6  ;;  %v2669_v11 = vpop.permute.xlu0 %2668  ;;  %v3606_v6 = vpack.c.bf16 %v2917_v5, %v2916_v4  ;;  %v3359_v7 = vld [vmem:[#allocation32] ss:$0 sm:$0xff] }
 0x7ad   : > { %v2674_v14 = vmul.f32 %v2669_v11, %v2650_v12  ;;  %p4363_p2 = por %p4362_p13, %p4361_p10 }
 0x7ae   : > { %v2627_v15 = vadd.f32 %v5233_v9, %v2331_v8  ;;  %v3355_v9 = vld [vmem:[#allocation26] ss:$0 sm:$0xff] }
 0x7af   : > { %2689 = vrot.lane.b32.xlu1 %v2674_v14, %s4499_s23  ;;  %p4364_p8 = pnand %p4363_p2, %p4357_p7 }
 0x7b0   : > { %2631 = vst.msk [vmem:[#allocation8] sm:$0xff] %vm1072_vm2, %v2627_v15  ;;  %v2654_v16 = vpop.permute.xlu0 %2653 }
 0x7b7   : > { %v2647_v17 = vld [vmem:[#allocation8] sm:$0xff] }
 0x7b8   : > { %v2671_v18 = vmul.f32 %v2654_v16, %v2647_v17 }
 0x7ba   : > { %2675 = vst.msk [vmem:[#allocation5] sm:$0xff] %vm1072_vm2, %v2671_v18 }
 0x818   : > { %v2678_v19 = vpop.permute.xlu1 %2677 }
 0x819   : > { %2681 = vst.msk [vmem:[#allocation5] sm:$0xff] %vm2680_vm5, %v2678_v19 }
 0x81c   : > { %v2684_v20 = vpop.permute.xlu0 %2683 }
 0x81d   : > { %2687 = vst.msk [vmem:[#allocation5] sm:$0xff] %vm2686_vm6, %v2684_v20 }
 0x821   : > { %v2690_v21 = vpop.permute.xlu1 %2689 }
 0x822   : > { %2693 = vst.msk [vmem:[#allocation5] sm:$0xff] %vm2692_vm7, %v2690_v21 }
 0x829   : > { %v2694_v22 = vld [vmem:[#allocation5] sm:$0xff] }
 0x82a   : > { %3506 = vmatmul.mubr.msk.f32.vlgmr.msra.gmra.mrb[6].mxu0 %vm796_vm0, %v2694_v22 }
 0x82b   : > { %3551 = vmatprep.mubr.msk.f32.mxu0 %vm4490_vm1, %v4491_v13  ;;  %v2809_v13 = vld [vmem:[#allocation30] sm:$0xff]  ;;  %3586 = vmatpush3.bf16.msra.mxu0 %v3585_v39 }
 0x82c   : > { %v3579_v34 = vpack.c.bf16 %v2810_v33, %v2809_v13  ;;  %3587 = vmatprep.subr.bf16.mxu0 %v4489_v10 }
 0x82e   : > { %3580 = vmatpush3.bf16.msra.mxu1 %v3579_v34 }
 0x82f   : > { %3581 = vmatprep.subr.bf16.mxu1 %v4489_v10  ;;  %3589 = vmatpush3.bf16.msra.mxu0 %v3588_v52 }
 0x830   : > { %3590 = vmatprep.subr.bf16.mxu0 %v4489_v10 }
 0x833   : > { %3592 = vmatpush3.bf16.msra.mxu0 %v3591_v47 }
 0x834   : > { %3593 = vmatprep.subr.bf16.mxu0 %v4489_v10 }
 0x837   : > { %3595 = vmatpush3.bf16.msra.mxu0 %v3594_v57 }
 0x838   : > { %3596 = vmatprep.subr.bf16.mxu0 %v4489_v10 }
 0x83b   : > { %3598 = vmatpush3.bf16.msra.mxu0 %v3597_v61 }
 0x83c   : > { %3599 = vmatprep.subr.bf16.mxu0 %v4489_v10 }
 0x83f   : > { %3601 = vmatpush3.bf16.msra.mxu0 %v3600_v63 }
 0x840   : > { %3602 = vmatprep.subr.bf16.mxu0 %v4489_v10 }
 0x843   : > { %3604 = vmatpush3.bf16.msra.mxu0 %v3603_v3 }
 0x844   : > { %3605 = vmatprep.subr.bf16.mxu0 %v4489_v10  ;;  %v3361_v10 = vld [vmem:[#allocation35] ss:$0 sm:$0xff] }
 0x847   : > { %3607 = vmatpush3.bf16.msra.mxu0 %v3606_v6 }
 0x8fd   : > { %v2775_v23 = vpop.f32.mrb[6].mxu0 }
 0x8fe   : > { %v2776_v25 = vadd.f32 %v3355_v9, %v2775_v23  ;;  %v3507_v28 = vpop.f32.mrb[7].mxu0 }
 0x900   : > { %v5254_v29 = vadd.f32 %v2776_v25, %v5086_v0  ;;  %v2811_v0 = vld [vmem:[#allocation30 + $0x10] sm:$0xff] }
 0x901   : > { %v3582_v36 = vpack.c.bf16 %v2812_v35, %v2811_v0 }
 0x902   : > { %v2782_v30 = vsel %vm796_vm0, %v5254_v29, 0.0 }
 0x903   : > { %2783 = vadd.xlane.f32.xlu0 %v2782_v30  ;;  %3583 = vmatpush3.bf16.msra.mxu1 %v3582_v36 }
 0x990   : > { %v2784_v24 = vpop.xlane.xlu0 %2783 }
 0x991   : > { %v2785_v26 = vmul.f32 0.03125, %v2784_v24 }
 0x993   : > { %v2786_v27 = vsub.f32 %v5254_v29, %v2785_v26 }
 0x995   : > { %v2787_v31 = vmul.f32 %v2786_v27, %v2786_v27 }
 0x997   : > { %v2788_v32 = vsel %vm796_vm0, %v2787_v31, 0.0 }
 0x998   : > { %2789 = vadd.xlane.f32.xlu1 %v2788_v32 }
 0xa25   : > { %v2790_v40 = vpop.xlane.xlu1 %2789 }
 0xa26   : > { %v2791_v41 = vmul.f32 0.03125, %v2790_v40 }
 0xa28   : > { %v2792_v42 = vadd.f32 1e-05, %v2791_v41 }
 0xa2a   : > { %3872 = vrsqrt.f32 %v2792_v42 }
 0xa34   : > { %v3873_v43 = vpop.eup %3872 }
 0xa35   : > { %v2794_v45 = vmul.f32 %v3873_v43, %v2786_v27 }
 0xa37   : > { %v2801_v48 = vmul.f32 %v3357_v44, %v2794_v45 }
 0xa39   : > { %v2808_v49 = vadd.f32 %v3358_v46, %v2801_v48 }
 0xa3b   : > { %3517 = vmatmul.mubr.msk.f32.vlgmr.msra.gmra.mrb[16].mxu1 %vm796_vm0, %v2808_v49 }
 0xb0e   : > { %v2889_v8 = vpop.f32.mrb[16].mxu1 }
 0xb0f   : > { %v2890_v11 = vadd.f32 %v3359_v7, %v2889_v8  ;;  %v3518_v12 = vpop.f32.mrb[17].mxu1 }
 0xb11   : > { %v2893_v14 = vmul.f32 %v2890_v11, %v2890_v11 }
 0xb13   : > { %v2894_v15 = vmul.f32 %v2893_v14, %v2890_v11 }
 0xb15   : > { %v2895_v16 = vmul.f32 0.044715, %v2894_v15 }
 0xb17   : > { %v2896_v17 = vadd.f32 %v2895_v16, %v2890_v11 }
 0xb19   : > { %v2897_v18 = vmul.f32 0.7978846, %v2896_v17 }
 0xb1b   : > { %3874 = vtanh.f32 %v2897_v18 }
 0xb25   : > { %v3875_v19 = vpop.eup %3874 }
 0xb26   : > { %v2899_v20 = vadd.f32 1.0, %v3875_v19 }
 0xb28   : > { %v2900_v21 = vmul.f32 0.5, %v2899_v20 }
 0xb2a   : > { %v2901_v22 = vmul.f32 %v2900_v21, %v2890_v11 }
 0xb2c   : > { %3552 = vmatmul.mubr.f32.vlgmr.msra.gmra.mrb[8].mxu0 %v2901_v22 }
 0xbff   : > { %v2991_v9 = vpop.f32.mrb[8].mxu0 }
 0xc00   : > { %v2992_v23 = vadd.f32 %v3361_v10, %v2991_v9  ;;  %v3553_v25 = vpop.f32.mrb[9].mxu0 }
 0xc02   : > { %v2995_v28 = vadd.f32 %v2992_v23, %v5254_v29 }
 0xc04   : > { %2996 = vst.msk [vmem:[%s792_s18] sm:$0xff] %vm796_vm0, %v2995_v28 }
 0xc05   : > { %4367 = shalt.err (!%p4364_p8)
}
 0xc06   : > { %s4368_s30 = scalar_lea.hbm %s5276_s5, 128  ;;  %s4372_s17 = scalar_lea.hbm %s5407_s4, 256 }
 0xc07   : > { %p4369_p9 = scmp.ne.s32.totalorder %s5276_s5, %s4368_s30  ;;  %p4373_p3 = scmp.lt.u32.totalorder %s5276_s5, %s5407_s4 }
 0xc08   : > { %p4374_p1 = scmp.lt.u32.totalorder %s4372_s17, %s4368_s30  ;;  %p4376_p11 = scmp.lt.u32.totalorder %s4368_s30, %s5276_s5 }
 0xc09   : > { %p4370_p4 = pnand %p4369_p9, %p5408_p0 }
 0xc0a   : > { %p4375_p12 = por %p4374_p1, %p4373_p3 }
 0xc0b   : > { %p4371_p6 = pneg %p4370_p4 }
 0xc0c   : > { %p4377_p5 = por %p4376_p11, %p4375_p12 }
 0xc0e   : > { %p4378_p7 = pnand %p4377_p5, %p4371_p6 }
 0xc10   : > { %4381 = shalt.err (!%p4378_p7)
}
 0xc11   : > { %3674 = dma.vmem_to_hbm [thread:$0]  (%p5408_p0), %s5278_s28, 128, %s5276_s5, %s2998_s1  }
 0xc12 PF: > { %s5409_s0 = sld [smem:[#allocation47_spill]]  ;;  %s5410_s22 = sld [smem:[#allocation52_spill]] }
 0xc13   : > { %p5411_p10 = scmp.ne.s32.totalorder %s5397_s21, 0 }
 0xc18   : > { %s3024_s3 = sand.u32 1, %s5409_s0   ;;  %p5412_p13 = scmp.ge.s32.totalorder %s5410_s22, 2 }
 0xc19   : > { %s3025_s24 = scalar_lea.sflag [#allocation11], %s3024_s3 }
 0xc1a   : > { %p3730_p2 = pnand %p5412_p13, %p5411_p10 }
 0xc1c   : > { %4443 = dma.done.wait (!%p3730_p2), %s3025_s24, 128  }
 0xc1d   : > { %4445 = vsyncadd (!%p3730_p2), %s3025_s24, 4294967168  ;;  %s41_s29 = sadd.s32 1, %s5410_s22   ;;  %s5413_s24 = sld [smem:[#allocation48_spill]] }
 0xc1e   : > { %p38_p8 = scmp.ge.s32.totalorder %s41_s29, 4   ;;  %s5414_s25 = sld [smem:[#allocation49_spill]] }
 0xc1f   : > { %s5415_s30 = sld [smem:[#allocation51_spill]]  ;;  %s5416_s26 = smov %s4994_s27 }
 0xc20   : > { %s5418_s28 = smov %s5420_s19  ;;  %40 = sbr.rel (!%p38_p8) target bundleno = 22 (0x16), region = 228 }
 0xc25   : > { %s5417_s27 = smov %s5415_s30 }
 0xc27   :  { %3030 = vsyncpa [#allocation10], 1 }
 0xc28   :  { %3032 = vsyncpa [#allocation10 + $0x1], 1 }
 0xc29   :  { %3033 = vsyncpa [#allocation13], 1 }
 0xc2a   :  { %3034 = vsyncpa [#allocation16], 1 }
 0xc2b   :  { %3035 = vsyncpa [#allocation19], 1 }
 0xc2c   :  { %3036 = vsyncpa [#allocation22], 1 }
 0xc2d   :  { %3037 = vsyncpa [#allocation25], 1 }
 0xc2e   :  { %3038 = vsyncpa [#allocation28], 1 }
 0xc2f   :  { %3039 = vsyncpa [#allocation31], 1 }
 0xc30   :  { %3040 = vsyncpa [#allocation34], 1 }
 0xc31   :  { %3041 = vsyncpa [#allocation11], 1 }
 0xc32   :  { %3043 = vsyncpa [#allocation11 + $0x1], 1 }

</bundles_post_ra>
